<compile_context>
chip_gen: v6e
topology: v6e:2x2x1
jax: 0.10.0
libtpu: 0.0.40
codegen_flags: <defaults>
</compile_context>

<pallas_src>
import functools
import math

import jax
import jax.numpy as jnp
from jax import lax
from jax.experimental import pallas as pl
from jax.experimental.pallas import tpu as pltpu

# Matmul operand dtype (accumulation is always f32).
MATMUL_DTYPE = jnp.bfloat16

# Tile targets (tunable per generation: 256-aligned for v6e MXU, smaller /
# store-light for v5e, budgeted for v7x's 64 MiB VMEM).
TM_TARGET = 256
TN_TARGET = 512
TK_TARGET = 512
TQ_TARGET = 256
TKV_TARGET = 256

_VMEM_LIMIT = 48 * 1024 * 1024  # above every default scoped limit, below v7x physical


def _pick_tile(dim, target, multiple=8):
    """Largest divisor of `dim` that is <= target and a multiple of `multiple`;
    falls back to the full extent (always a legal block shape)."""
    if dim <= target:
        return dim
    for t in range(target, multiple - 1, -1):
        if dim % t == 0 and t % multiple == 0:
            return t
    return dim


def _cparams(dimension_semantics):
    return pltpu.CompilerParams(
        dimension_semantics=dimension_semantics,
        vmem_limit_bytes=_VMEM_LIMIT,
    )


# --------------------- fused LayerNorm + Linear (+ReLU) ----------------------
def _ln_linear_kernel(x_ref, g_ref, bt_ref, w_ref, b_ref, o_ref, *, eps, activation):
    x = x_ref[...].astype(jnp.float32)                      # (tm, K)
    k = x.shape[-1]
    mean = jnp.mean(x, axis=-1, keepdims=True)
    xc = x - mean
    # torch.std default is unbiased: divide by (K - 1); eps added to std.
    var = jnp.sum(xc * xc, axis=-1, keepdims=True) * (1.0 / (k - 1))
    inv = pl.reciprocal(jnp.sqrt(var) + eps, approx=True)   # EUP, not VPU divide
    xn = (g_ref[...] * xc * inv + bt_ref[...]).astype(MATMUL_DTYPE)
    y = jnp.dot(xn, w_ref[...].astype(MATMUL_DTYPE),
                preferred_element_type=jnp.float32)         # MXU, f32 accumulate
    y = y + b_ref[...]
    if activation == "relu":
        y = jnp.maximum(y, 0.0)
    o_ref[...] = y.astype(o_ref.dtype)


def ln_linear(x2, gamma, beta, w, b, activation="none", eps=1e-6):
    """LayerNorm(x) @ w + b (+ReLU).  x2: (M, K), w: (K, N)."""
    M, K = x2.shape
    _, N = w.shape
    tm = _pick_tile(M, TM_TARGET, 8)
    tn = _pick_tile(N, TN_TARGET, 128)
    return pl.pallas_call(
        functools.partial(_ln_linear_kernel, eps=eps, activation=activation),
        out_shape=jax.ShapeDtypeStruct((M, N), x2.dtype),
        grid_spec=pltpu.PrefetchScalarGridSpec(
            num_scalar_prefetch=0,
            grid=(M // tm, N // tn),
            in_specs=[
                pl.BlockSpec((tm, K), lambda i, j: (i, 0)),
                pl.BlockSpec((1, K), lambda i, j: (0, 0)),
                pl.BlockSpec((1, K), lambda i, j: (0, 0)),
                pl.BlockSpec((K, tn), lambda i, j: (0, j)),
                pl.BlockSpec((1, tn), lambda i, j: (0, j)),
            ],
            out_specs=pl.BlockSpec((tm, tn), lambda i, j: (i, j)),
        ),
        compiler_params=_cparams(("parallel", "parallel")),
    )(x2, gamma.reshape(1, K), beta.reshape(1, K), w, b.reshape(1, N))


# ------------- tiled matmul + bias + residual (K-axis accumulator) -----------
def _linear_resid_kernel(a_ref, w_ref, b_ref, r_ref, o_ref, acc_ref):
    k = pl.program_id(2)

    @pl.when(k == 0)
    def _():
        acc_ref[...] = jnp.zeros(acc_ref.shape, acc_ref.dtype)

    acc_ref[...] += jnp.dot(
        a_ref[...].astype(MATMUL_DTYPE),
        w_ref[...].astype(MATMUL_DTYPE),
        preferred_element_type=jnp.float32,
    )

    @pl.when(k == pl.num_programs(2) - 1)
    def _():
        o_ref[...] = (acc_ref[...] + b_ref[...] + r_ref[...]).astype(o_ref.dtype)


def linear_residual(a, w, b, residual):
    """residual + a @ w + b.  a: (M, K), w: (K, N), residual: (M, N)."""
    M, K = a.shape
    _, N = w.shape
    tm = _pick_tile(M, TM_TARGET, 8)
    tn = _pick_tile(N, TN_TARGET, 128)
    tk = _pick_tile(K, TK_TARGET, 128)
    return pl.pallas_call(
        _linear_resid_kernel,
        out_shape=jax.ShapeDtypeStruct((M, N), a.dtype),
        grid_spec=pltpu.PrefetchScalarGridSpec(
            num_scalar_prefetch=0,
            grid=(M // tm, N // tn, K // tk),
            in_specs=[
                pl.BlockSpec((tm, tk), lambda i, j, k: (i, k)),
                pl.BlockSpec((tk, tn), lambda i, j, k: (k, j)),
                pl.BlockSpec((1, tn), lambda i, j, k: (0, j)),
                pl.BlockSpec((tm, tn), lambda i, j, k: (i, j)),
            ],
            out_specs=pl.BlockSpec((tm, tn), lambda i, j, k: (i, j)),
            scratch_shapes=[pltpu.VMEM((tm, tn), jnp.float32)],
        ),
        # Residual input (index 3) aliases the output buffer: no extra HBM
        # allocation, in-place add-into-residual (P8).  Residual tile (i,j) is
        # only read while computing output tile (i,j), so no hazard.
        input_output_aliases={3: 0},
        compiler_params=_cparams(("parallel", "parallel", "arbitrary")),
    )(a, w, b.reshape(1, N), residual)


# ----------------------- flash-style self-attention --------------------------
def _flash_kernel(q_ref, k_ref, v_ref, mask_ref, o_ref, m_sc, l_sc, acc_sc, *, scale):
    ki = pl.program_id(3)

    @pl.when(ki == 0)
    def _():
        m_sc[...] = jnp.full(m_sc.shape, -jnp.inf, dtype=m_sc.dtype)
        l_sc[...] = jnp.zeros(l_sc.shape, l_sc.dtype)
        acc_sc[...] = jnp.zeros(acc_sc.shape, acc_sc.dtype)

    q = q_ref[0, 0].astype(MATMUL_DTYPE)                    # (tq, dk)
    kk = k_ref[0, 0].astype(MATMUL_DTYPE)                   # (tkv, dk)
    v = v_ref[0, 0].astype(MATMUL_DTYPE)                    # (tkv, dk)

    s = lax.dot_general(q, kk, (((1,), (1,)), ((), ())),
                        preferred_element_type=jnp.float32) * scale  # (tq, tkv)
    msk = mask_ref[0]                                       # (1, tkv)
    s = jnp.where(msk == 0.0, -1e9, s)                      # masked_fill(mask==0, -1e9)

    m_prev = m_sc[...]
    m_new = jnp.maximum(m_prev, jnp.max(s, axis=-1, keepdims=True))
    alpha = jnp.exp(m_prev - m_new)
    p = jnp.exp(s - m_new)
    l_sc[...] = alpha * l_sc[...] + jnp.sum(p, axis=-1, keepdims=True)
    acc_sc[...] = alpha * acc_sc[...] + jnp.dot(
        p.astype(MATMUL_DTYPE), v, preferred_element_type=jnp.float32)
    m_sc[...] = m_new

    @pl.when(ki == pl.num_programs(3) - 1)
    def _():
        o_ref[0, 0] = (acc_sc[...] *
                       pl.reciprocal(l_sc[...], approx=True)).astype(o_ref.dtype)


def flash_attention(q, k, v, mask):
    """q, k, v: (B, H, S, dk); mask: (B, 1, S) float {0,1}."""
    B, H, S, dk = q.shape
    tq = _pick_tile(S, TQ_TARGET, 8)
    tkv = _pick_tile(S, TKV_TARGET, 128)
    scale = 1.0 / math.sqrt(dk)
    return pl.pallas_call(
        functools.partial(_flash_kernel, scale=scale),
        out_shape=jax.ShapeDtypeStruct((B, H, S, dk), q.dtype),
        grid_spec=pltpu.PrefetchScalarGridSpec(
            num_scalar_prefetch=0,
            grid=(B, H, S // tq, S // tkv),
            in_specs=[
                pl.BlockSpec((1, 1, tq, dk), lambda b, h, qi, ki: (b, h, qi, 0)),
                pl.BlockSpec((1, 1, tkv, dk), lambda b, h, qi, ki: (b, h, ki, 0)),
                pl.BlockSpec((1, 1, tkv, dk), lambda b, h, qi, ki: (b, h, ki, 0)),
                pl.BlockSpec((1, 1, tkv), lambda b, h, qi, ki: (b, 0, ki)),
            ],
            out_specs=pl.BlockSpec((1, 1, tq, dk), lambda b, h, qi, ki: (b, h, qi, 0)),
            scratch_shapes=[
                pltpu.VMEM((tq, 1), jnp.float32),   # running max m
                pltpu.VMEM((tq, 1), jnp.float32),   # running denom l
                pltpu.VMEM((tq, dk), jnp.float32),  # output accumulator
            ],
        ),
        compiler_params=_cparams(("parallel", "parallel", "parallel", "arbitrary")),
    )(q, k, v, mask)


# ------------------------------ final LayerNorm ------------------------------
def _layernorm_kernel(x_ref, g_ref, b_ref, o_ref, *, eps):
    x = x_ref[...].astype(jnp.float32)
    d = x.shape[-1]
    mean = jnp.mean(x, axis=-1, keepdims=True)
    xc = x - mean
    var = jnp.sum(xc * xc, axis=-1, keepdims=True) * (1.0 / (d - 1))
    inv = pl.reciprocal(jnp.sqrt(var) + eps, approx=True)
    o_ref[...] = (g_ref[...] * xc * inv + b_ref[...]).astype(o_ref.dtype)


def layernorm(x2, gamma, beta, eps=1e-6):
    M, D = x2.shape
    tm = _pick_tile(M, 512, 8)
    return pl.pallas_call(
        functools.partial(_layernorm_kernel, eps=eps),
        out_shape=jax.ShapeDtypeStruct((M, D), x2.dtype),
        grid_spec=pltpu.PrefetchScalarGridSpec(
            num_scalar_prefetch=0,
            grid=(M // tm,),
            in_specs=[
                pl.BlockSpec((tm, D), lambda i: (i, 0)),
                pl.BlockSpec((1, D), lambda i: (0, 0)),
                pl.BlockSpec((1, D), lambda i: (0, 0)),
            ],
            out_specs=pl.BlockSpec((tm, D), lambda i: (i, 0)),
        ),
        compiler_params=_cparams(("parallel",)),
    )(x2, gamma.reshape(1, D), beta.reshape(1, D))


# ------------------------------- encoder layer --------------------------------
def encoder_layer(p, x2, mask, B, S, h):
    M, D = x2.shape
    dk = D // h

    # Sublayer 0: x + self_attn(LN(x))   (dropout = identity)
    qkv = ln_linear(x2, p["ln0_a"], p["ln0_b"], p["wqkv"], p["bqkv"])   # (M, 3D)

    # Single XLA transpose for the Q/K/V head split (instead of three).
    # TODO(synk): keep the lane dim at D inside the attention kernel (per-head
    # column slicing via index_map) to drop this transpose when dk < 128.
    qkv5 = qkv.reshape(B, S, 3, h, dk).transpose(2, 0, 3, 1, 4)          # (3,B,h,S,dk)
    q, k, v = qkv5[0], qkv5[1], qkv5[2]

    attn = flash_attention(q, k, v, mask)                                # (B,h,S,dk)
    attn = attn.transpose(0, 2, 1, 3).reshape(M, D)
    x2 = linear_residual(attn, p["wo"], p["bo"], x2)                     # +residual

    # Sublayer 1: x + ff(LN(x))
    ff = ln_linear(x2, p["ln1_a"], p["ln1_b"], p["ff_w1"], p["ff_b1"],
                   activation="relu")                                    # (M, d_ff)
    x2 = linear_residual(ff, p["ff_w2"], p["ff_b2"], x2)                 # +residual
    return x2


def encoder(params, x, mask, h):
    B, S, D = x.shape
    x2 = x.reshape(B * S, D)
    # TODO(synk): overlap next-layer weight DMA with current-layer compute
    # (cross-call future / single pallas_call with a layer grid axis).
    for lp in params["layers"]:
        x2 = encoder_layer(lp, x2, mask, B, S, h)
    out = layernorm(x2, params["norm_a"], params["norm_b"])
    return out.reshape(B, S, D)


# --------------------------- parameter construction --------------------------
def init_params(key, n_layers, d_model, d_ff):
    """Weights stored as (in, out) = transpose of torch Linear's (out, in);
    Q/K/V projections are fused into a single (d_model, 3*d_model) matrix."""
    def lin(k, fan_in, fan_out):
        kw, kb = jax.random.split(k)
        w = jax.random.normal(kw, (fan_in, fan_out), jnp.float32) * 0.02
        b = jax.random.normal(kb, (fan_out,), jnp.float32) * 0.02
        return w, b

    layers = []
    for _ in range(n_layers):
        keys = jax.random.split(key, 8)
        key = keys[0]
        wq, bq = lin(keys[1], d_model, d_model)
        wk, bk = lin(keys[2], d_model, d_model)
        wv, bv = lin(keys[3], d_model, d_model)
        wo, bo = lin(keys[4], d_model, d_model)
        w1, b1 = lin(keys[5], d_model, d_ff)
        w2, b2 = lin(keys[6], d_ff, d_model)
        layers.append(dict(
            wqkv=jnp.concatenate([wq, wk, wv], axis=1),     # (D, 3D) fused QKV
            bqkv=jnp.concatenate([bq, bk, bv], axis=0),     # (3D,)
            wo=wo, bo=bo,
            ff_w1=w1, ff_b1=b1, ff_w2=w2, ff_b2=b2,
            ln0_a=jnp.ones((d_model,), jnp.float32),
            ln0_b=jnp.zeros((d_model,), jnp.float32),
            ln1_a=jnp.ones((d_model,), jnp.float32),
            ln1_b=jnp.zeros((d_model,), jnp.float32),
        ))
    return dict(
        layers=layers,
        norm_a=jnp.ones((d_model,), jnp.float32),   # final LayerNorm a_2
        norm_b=jnp.zeros((d_model,), jnp.float32),  # final LayerNorm b_2
    )


if __name__ == "__main__":
    B, S, D, H, DFF, NLAYERS = 2, 8, 32, 4, 64, 2
    key = jax.random.PRNGKey(0)
    kx, kp = jax.random.split(key)
    x = jax.random.normal(kx, (B, S, D), jnp.float32)
    # src mask (B, 1, S): pad out the last 2 tokens of batch element 1
    mask = jnp.ones((B, 1, S), jnp.float32).at[1, 0, -2:].set(0.0)

    params = init_params(kp, NLAYERS, D, DFF)
    fwd = jax.jit(lambda p, xx, mm: encoder(p, xx, mm, H))
    out = fwd(params, x, mask)
    jax.block_until_ready(out)
    assert out.shape == (B, S, D)
    assert bool(jnp.all(jnp.isfinite(out)))
    print("KERNEL_OK")
</pallas_src>

<mosaic_0001>
module attributes {stable_mosaic.version = 11 : i64} {
  func.func @_ln_linear_kernel(%arg0: i32, %arg1: i32, %arg2: memref<16x32xf32, #tpu.memory_space<vmem>>, %arg3: memref<1x32xf32, #tpu.memory_space<vmem>>, %arg4: memref<1x32xf32, #tpu.memory_space<vmem>>, %arg5: memref<32x96xf32, #tpu.memory_space<vmem>>, %arg6: memref<1x96xf32, #tpu.memory_space<vmem>>, %arg7: memref<16x96xf32, #tpu.memory_space<vmem>>) attributes {dimension_semantics = [#tpu.dimension_semantics<parallel>, #tpu.dimension_semantics<parallel>], iteration_bounds = array<i64: 1, 1>, scalar_prefetch = 0 : i64, scratch_operands = 0 : i64, tpu.core_type = #tpu.core_type<tc>, window_params = [{transform_indices = @transform_0, window_bounds = array<i64: 16, 32>}, {pipeline_mode = #tpu.pipeline_mode<synchronous>, transform_indices = @transform_1, window_bounds = array<i64: 1, 32>}, {pipeline_mode = #tpu.pipeline_mode<synchronous>, transform_indices = @transform_2, window_bounds = array<i64: 1, 32>}, {transform_indices = @transform_3, window_bounds = array<i64: 32, 96>}, {transform_indices = @transform_4, window_bounds = array<i64: 1, 96>}, {transform_indices = @transform_5, window_bounds = array<i64: 16, 96>}]} {
    %c0 = arith.constant 0 : index
    %c0_0 = arith.constant 0 : index
    %0 = vector.load %arg2[%c0, %c0_0] : memref<16x32xf32, #tpu.memory_space<vmem>>, vector<16x32xf32>
    %cst = arith.constant dense<0.000000e+00> : vector<16xf32>
    %1 = vector.multi_reduction <add>, %0, %cst [1] : vector<16x32xf32> to vector<16xf32>
    %2 = vector.shape_cast %1 : vector<16xf32> to vector<16x1xf32>
    %cst_1 = arith.constant 3.200000e+01 : f32
    %3 = vector.broadcast %cst_1 : f32 to vector<16x1xf32>
    %4 = arith.divf %2, %3 : vector<16x1xf32>
    %5 = vector.broadcast %4 : vector<16x1xf32> to vector<16x32xf32>
    %6 = arith.subf %0, %5 : vector<16x32xf32>
    %7 = arith.mulf %6, %6 : vector<16x32xf32>
    %cst_2 = arith.constant dense<0.000000e+00> : vector<16xf32>
    %8 = vector.multi_reduction <add>, %7, %cst_2 [1] : vector<16x32xf32> to vector<16xf32>
    %9 = vector.shape_cast %8 : vector<16xf32> to vector<16x1xf32>
    %cst_3 = arith.constant 0.0322580636 : f32
    %10 = vector.broadcast %cst_3 : f32 to vector<16x1xf32>
    %11 = arith.mulf %9, %10 : vector<16x1xf32>
    %12 = math.sqrt %11 : vector<16x1xf32>
    %cst_4 = arith.constant 9.99999997E-7 : f32
    %13 = vector.broadcast %cst_4 : f32 to vector<16x1xf32>
    %14 = arith.addf %12, %13 : vector<16x1xf32>
    %15 = tpu.reciprocal %14 {approx = true} : vector<16x1xf32> -> vector<16x1xf32>
    %c0_5 = arith.constant 0 : index
    %c0_6 = arith.constant 0 : index
    %16 = vector.load %arg3[%c0_5, %c0_6] : memref<1x32xf32, #tpu.memory_space<vmem>>, vector<1x32xf32>
    %17 = vector.broadcast %16 : vector<1x32xf32> to vector<16x32xf32>
    %18 = arith.mulf %17, %6 : vector<16x32xf32>
    %19 = vector.broadcast %15 : vector<16x1xf32> to vector<16x32xf32>
    %20 = arith.mulf %18, %19 : vector<16x32xf32>
    %c0_7 = arith.constant 0 : index
    %c0_8 = arith.constant 0 : index
    %21 = vector.load %arg4[%c0_7, %c0_8] : memref<1x32xf32, #tpu.memory_space<vmem>>, vector<1x32xf32>
    %22 = vector.broadcast %21 : vector<1x32xf32> to vector<16x32xf32>
    %23 = arith.addf %20, %22 : vector<16x32xf32>
    %24 = arith.truncf %23 : vector<16x32xf32> to vector<16x32xbf16>
    %c0_9 = arith.constant 0 : index
    %c0_10 = arith.constant 0 : index
    %25 = vector.load %arg5[%c0_9, %c0_10] : memref<32x96xf32, #tpu.memory_space<vmem>>, vector<32x96xf32>
    %26 = arith.truncf %25 : vector<32x96xf32> to vector<32x96xbf16>
    %cst_11 = arith.constant dense<0.000000e+00> : vector<16x96xf32>
    %27 = tpu.matmul %24, %26, %cst_11 {dimension_numbers = #tpu.dot_dimension_numbers<[1], [0], [0], [1], [0, 0, 1, 1], [], []>} : vector<16x32xbf16>, vector<32x96xbf16>, vector<16x96xf32> -> vector<16x96xf32>
    %c0_12 = arith.constant 0 : index
    %c0_13 = arith.constant 0 : index
    %28 = vector.load %arg6[%c0_12, %c0_13] : memref<1x96xf32, #tpu.memory_space<vmem>>, vector<1x96xf32>
    %29 = vector.broadcast %28 : vector<1x96xf32> to vector<16x96xf32>
    %30 = arith.addf %27, %29 : vector<16x96xf32>
    %c0_14 = arith.constant 0 : index
    %c0_15 = arith.constant 0 : index
    %31 = vector.load %arg7[%c0_14, %c0_15] : memref<16x96xf32, #tpu.memory_space<vmem>>, vector<16x96xf32>
    tpu.vector_store %arg7[%c0_14, %c0_15], %30 {strides = array<i32>} : memref<16x96xf32, #tpu.memory_space<vmem>>, vector<16x96xf32>,
    return
  }
  func.func @transform_0(%arg0: i32, %arg1: i32) -> (i32, i32) {
    %c0_i32 = arith.constant 0 : i32
    %c0_i32_0 = arith.constant 0 : i32
    return %arg0, %c0_i32 : i32, i32
  }
  func.func @transform_1(%arg0: i32, %arg1: i32) -> (i32, i32) {
    %c0_i32 = arith.constant 0 : i32
    %c0_i32_0 = arith.constant 0 : i32
    %c0_i32_1 = arith.constant 0 : i32
    return %c0_i32, %c0_i32_0 : i32, i32
  }
  func.func @transform_2(%arg0: i32, %arg1: i32) -> (i32, i32) {
    %c0_i32 = arith.constant 0 : i32
    %c0_i32_0 = arith.constant 0 : i32
    %c0_i32_1 = arith.constant 0 : i32
    return %c0_i32, %c0_i32_0 : i32, i32
  }
  func.func @transform_3(%arg0: i32, %arg1: i32) -> (i32, i32) {
    %c0_i32 = arith.constant 0 : i32
    %c0_i32_0 = arith.constant 0 : i32
    return %c0_i32, %arg1 : i32, i32
  }
  func.func @transform_4(%arg0: i32, %arg1: i32) -> (i32, i32) {
    %c0_i32 = arith.constant 0 : i32
    %c0_i32_0 = arith.constant 0 : i32
    return %c0_i32, %arg1 : i32, i32
  }
  func.func @transform_5(%arg0: i32, %arg1: i32) -> (i32, i32) {
    %c0_i32 = arith.constant 0 : i32
    return %arg0, %arg1 : i32, i32
  }
}

module attributes {stable_mosaic.version = 11 : i64} {
  func.func @_flash_kernel(%arg0: i32, %arg1: i32, %arg2: i32, %arg3: i32, %arg4: memref<1x1x8x8xf32, #tpu.memory_space<vmem>>, %arg5: memref<1x1x8x8xf32, #tpu.memory_space<vmem>>, %arg6: memref<1x1x8x8xf32, #tpu.memory_space<vmem>>, %arg7: memref<1x1x8xf32, #tpu.memory_space<vmem>>, %arg8: memref<1x1x8x8xf32, #tpu.memory_space<vmem>>, %arg9: memref<8x1xf32, #tpu.memory_space<vmem>>, %arg10: memref<8x1xf32, #tpu.memory_space<vmem>>, %arg11: memref<8x8xf32, #tpu.memory_space<vmem>>) attributes {dimension_semantics = [#tpu.dimension_semantics<parallel>, #tpu.dimension_semantics<parallel>, #tpu.dimension_semantics<parallel>, #tpu.dimension_semantics<arbitrary>], iteration_bounds = array<i64: 2, 4, 1, 1>, scalar_prefetch = 0 : i64, scratch_operands = 3 : i64, tpu.core_type = #tpu.core_type<tc>, window_params = [{transform_indices = @transform_0, window_bounds = array<i64: 1, 1, 8, 8>}, {transform_indices = @transform_1, window_bounds = array<i64: 1, 1, 8, 8>}, {transform_indices = @transform_2, window_bounds = array<i64: 1, 1, 8, 8>}, {transform_indices = @transform_3, window_bounds = array<i64: 1, 1, 8>}, {transform_indices = @transform_4, window_bounds = array<i64: 1, 1, 8, 8>}]} {
    %c0_i32 = arith.constant 0 : i32
    %0 = arith.cmpi eq, %arg3, %c0_i32 : i32
    %1 = arith.extui %0 : i1 to i32
    %c0_i32_0 = arith.constant 0 : i32
    %2 = arith.cmpi ne, %1, %c0_i32_0 : i32
    scf.if %2 {
      %cst_35 = arith.constant 0xFF800000 : f32
      %49 = vector.broadcast %cst_35 : f32 to vector<8x1xf32>
      %c0_36 = arith.constant 0 : index
      %c0_37 = arith.constant 0 : index
      %50 = vector.load %arg9[%c0_36, %c0_37] : memref<8x1xf32, #tpu.memory_space<vmem>>, vector<8x1xf32>
      tpu.vector_store %arg9[%c0_36, %c0_37], %49 {strides = array<i32>} : memref<8x1xf32, #tpu.memory_space<vmem>>, vector<8x1xf32>,
      %cst_38 = arith.constant 0.000000e+00 : f32
      %51 = vector.broadcast %cst_38 : f32 to vector<8x1xf32>
      %c0_39 = arith.constant 0 : index
      %c0_40 = arith.constant 0 : index
      %52 = vector.load %arg10[%c0_39, %c0_40] : memref<8x1xf32, #tpu.memory_space<vmem>>, vector<8x1xf32>
      tpu.vector_store %arg10[%c0_39, %c0_40], %51 {strides = array<i32>} : memref<8x1xf32, #tpu.memory_space<vmem>>, vector<8x1xf32>,
      %cst_41 = arith.constant 0.000000e+00 : f32
      %53 = vector.broadcast %cst_41 : f32 to vector<8x8xf32>
      %c0_42 = arith.constant 0 : index
      %c0_43 = arith.constant 0 : index
      %54 = vector.load %arg11[%c0_42, %c0_43] : memref<8x8xf32, #tpu.memory_space<vmem>>, vector<8x8xf32>
      tpu.vector_store %arg11[%c0_42, %c0_43], %53 {strides = array<i32>} : memref<8x8xf32, #tpu.memory_space<vmem>>, vector<8x8xf32>,
    } else {
    }
    %c0 = arith.constant 0 : index
    %c0_1 = arith.constant 0 : index
    %c0_2 = arith.constant 0 : index
    %c0_3 = arith.constant 0 : index
    %3 = vector.load %arg4[%c0, %c0_1, %c0_2, %c0_3] : memref<1x1x8x8xf32, #tpu.memory_space<vmem>>, vector<1x1x8x8xf32>
    %4 = vector.shape_cast %3 : vector<1x1x8x8xf32> to vector<8x8xf32>
    %5 = arith.truncf %4 : vector<8x8xf32> to vector<8x8xbf16>
    %c0_4 = arith.constant 0 : index
    %c0_5 = arith.constant 0 : index
    %c0_6 = arith.constant 0 : index
    %c0_7 = arith.constant 0 : index
    %6 = vector.load %arg5[%c0_4, %c0_5, %c0_6, %c0_7] : memref<1x1x8x8xf32, #tpu.memory_space<vmem>>, vector<1x1x8x8xf32>
    %7 = vector.shape_cast %6 : vector<1x1x8x8xf32> to vector<8x8xf32>
    %8 = arith.truncf %7 : vector<8x8xf32> to vector<8x8xbf16>
    %c0_8 = arith.constant 0 : index
    %c0_9 = arith.constant 0 : index
    %c0_10 = arith.constant 0 : index
    %c0_11 = arith.constant 0 : index
    %9 = vector.load %arg6[%c0_8, %c0_9, %c0_10, %c0_11] : memref<1x1x8x8xf32, #tpu.memory_space<vmem>>, vector<1x1x8x8xf32>
    %10 = vector.shape_cast %9 : vector<1x1x8x8xf32> to vector<8x8xf32>
    %11 = arith.truncf %10 : vector<8x8xf32> to vector<8x8xbf16>
    %cst = arith.constant dense<0.000000e+00> : vector<8x8xf32>
    %12 = tpu.matmul %5, %8, %cst {dimension_numbers = #tpu.dot_dimension_numbers<[1], [1], [0], [0], [0, 0, 1, 0], [], []>} : vector<8x8xbf16>, vector<8x8xbf16>, vector<8x8xf32> -> vector<8x8xf32>
    %cst_12 = arith.constant 0.353553385 : f32
    %13 = vector.broadcast %cst_12 : f32 to vector<8x8xf32>
    %14 = arith.mulf %12, %13 : vector<8x8xf32>
    %c0_13 = arith.constant 0 : index
    %c0_14 = arith.constant 0 : index
    %c0_15 = arith.constant 0 : index
    %15 = vector.load %arg7[%c0_13, %c0_14, %c0_15] : memref<1x1x8xf32, #tpu.memory_space<vmem>>, vector<1x1x8xf32>
    %16 = vector.shape_cast %15 : vector<1x1x8xf32> to vector<1x8xf32>
    %cst_16 = arith.constant 0.000000e+00 : f32
    %17 = vector.broadcast %cst_16 : f32 to vector<1x8xf32>
    %18 = arith.cmpf oeq, %16, %17 : vector<1x8xf32>
    %cst_17 = arith.constant -1.000000e+09 : f32
    %19 = vector.shape_cast %18 : vector<1x8xi1> to vector<1x8xi1>
    %20 = vector.broadcast %19 : vector<1x8xi1> to vector<8x8xi1>
    %21 = vector.broadcast %cst_17 : f32 to vector<8x8xf32>
    %22 = arith.select %20, %21, %14 : vector<8x8xi1>, vector<8x8xf32>
    %c0_18 = arith.constant 0 : index
    %c0_19 = arith.constant 0 : index
    %23 = vector.load %arg9[%c0_18, %c0_19] : memref<8x1xf32, #tpu.memory_space<vmem>>, vector<8x1xf32>
    %cst_20 = arith.constant dense<0xFF800000> : vector<8xf32>
    %24 = vector.multi_reduction <maximumf>, %22, %cst_20 [1] : vector<8x8xf32> to vector<8xf32>
    %25 = vector.shape_cast %24 : vector<8xf32> to vector<8x1xf32>
    %26 = arith.maximumf %23, %25 : vector<8x1xf32>
    %27 = arith.subf %23, %26 : vector<8x1xf32>
    %28 = math.exp %27 : vector<8x1xf32>
    %29 = vector.broadcast %26 : vector<8x1xf32> to vector<8x8xf32>
    %30 = arith.subf %22, %29 : vector<8x8xf32>
    %31 = math.exp %30 : vector<8x8xf32>
    %c0_21 = arith.constant 0 : index
    %c0_22 = arith.constant 0 : index
    %32 = vector.load %arg10[%c0_21, %c0_22] : memref<8x1xf32, #tpu.memory_space<vmem>>, vector<8x1xf32>
    %33 = arith.mulf %28, %32 : vector<8x1xf32>
    %cst_23 = arith.constant dense<0.000000e+00> : vector<8xf32>
    %34 = vector.multi_reduction <add>, %31, %cst_23 [1] : vector<8x8xf32> to vector<8xf32>
    %35 = vector.shape_cast %34 : vector<8xf32> to vector<8x1xf32>
    %36 = arith.addf %33, %35 : vector<8x1xf32>
    %c0_24 = arith.constant 0 : index
    %c0_25 = arith.constant 0 : index
    %37 = vector.load %arg10[%c0_24, %c0_25] : memref<8x1xf32, #tpu.memory_space<vmem>>, vector<8x1xf32>
    tpu.vector_store %arg10[%c0_24, %c0_25], %36 {strides = array<i32>} : memref<8x1xf32, #tpu.memory_space<vmem>>, vector<8x1xf32>,
    %c0_26 = arith.constant 0 : index
    %c0_27 = arith.constant 0 : index
    %38 = vector.load %arg11[%c0_26, %c0_27] : memref<8x8xf32, #tpu.memory_space<vmem>>, vector<8x8xf32>
    %39 = vector.broadcast %28 : vector<8x1xf32> to vector<8x8xf32>
    %40 = arith.mulf %39, %38 : vector<8x8xf32>
    %41 = arith.truncf %31 : vector<8x8xf32> to vector<8x8xbf16>
    %cst_28 = arith.constant dense<0.000000e+00> : vector<8x8xf32>
    %42 = tpu.matmul %41, %11, %cst_28 {dimension_numbers = #tpu.dot_dimension_numbers<[1], [0], [0], [1], [0, 0, 1, 1], [], []>} : vector<8x8xbf16>, vector<8x8xbf16>, vector<8x8xf32> -> vector<8x8xf32>
    %43 = arith.addf %40, %42 : vector<8x8xf32>
    %c0_29 = arith.constant 0 : index
    %c0_30 = arith.constant 0 : index
    %44 = vector.load %arg11[%c0_29, %c0_30] : memref<8x8xf32, #tpu.memory_space<vmem>>, vector<8x8xf32>
    tpu.vector_store %arg11[%c0_29, %c0_30], %43 {strides = array<i32>} : memref<8x8xf32, #tpu.memory_space<vmem>>, vector<8x8xf32>,
    %c0_31 = arith.constant 0 : index
    %c0_32 = arith.constant 0 : index
    %45 = vector.load %arg9[%c0_31, %c0_32] : memref<8x1xf32, #tpu.memory_space<vmem>>, vector<8x1xf32>
    tpu.vector_store %arg9[%c0_31, %c0_32], %26 {strides = array<i32>} : memref<8x1xf32, #tpu.memory_space<vmem>>, vector<8x1xf32>,
    %c0_i32_33 = arith.constant 0 : i32
    %46 = arith.cmpi eq, %arg3, %c0_i32_33 : i32
    %47 = arith.extui %46 : i1 to i32
    %c0_i32_34 = arith.constant 0 : i32
    %48 = arith.cmpi ne, %47, %c0_i32_34 : i32
    scf.if %48 {
      %c0_35 = arith.constant 0 : index
      %c0_36 = arith.constant 0 : index
      %49 = vector.load %arg11[%c0_35, %c0_36] : memref<8x8xf32, #tpu.memory_space<vmem>>, vector<8x8xf32>
      %c0_37 = arith.constant 0 : index
      %c0_38 = arith.constant 0 : index
      %50 = vector.load %arg10[%c0_37, %c0_38] : memref<8x1xf32, #tpu.memory_space<vmem>>, vector<8x1xf32>
      %51 = tpu.reciprocal %50 {approx = true} : vector<8x1xf32> -> vector<8x1xf32>
      %52 = vector.broadcast %51 : vector<8x1xf32> to vector<8x8xf32>
      %53 = arith.mulf %49, %52 : vector<8x8xf32>
      %c0_39 = arith.constant 0 : index
      %c0_40 = arith.constant 0 : index
      %c0_41 = arith.constant 0 : index
      %c0_42 = arith.constant 0 : index
      %54 = vector.load %arg8[%c0_39, %c0_40, %c0_41, %c0_42] : memref<1x1x8x8xf32, #tpu.memory_space<vmem>>, vector<1x1x8x8xf32>
      %55 = vector.shape_cast %54 : vector<1x1x8x8xf32> to vector<8x8xf32>
      %56 = vector.shape_cast %53 : vector<8x8xf32> to vector<1x1x8x8xf32>
      tpu.vector_store %arg8[%c0_39, %c0_40, %c0_41, %c0_42], %56 {strides = array<i32>} : memref<1x1x8x8xf32, #tpu.memory_space<vmem>>, vector<1x1x8x8xf32>,
    } else {
    }
    return
  }
  func.func @transform_0(%arg0: i32, %arg1: i32, %arg2: i32, %arg3: i32) -> (i32, i32, i32, i32) {
    %c0_i32 = arith.constant 0 : i32
    %c0_i32_0 = arith.constant 0 : i32
    return %arg0, %arg1, %arg2, %c0_i32 : i32, i32, i32, i32
  }
  func.func @transform_1(%arg0: i32, %arg1: i32, %arg2: i32, %arg3: i32) -> (i32, i32, i32, i32) {
    %c0_i32 = arith.constant 0 : i32
    %c0_i32_0 = arith.constant 0 : i32
    return %arg0, %arg1, %arg3, %c0_i32 : i32, i32, i32, i32
  }
  func.func @transform_2(%arg0: i32, %arg1: i32, %arg2: i32, %arg3: i32) -> (i32, i32, i32, i32) {
    %c0_i32 = arith.constant 0 : i32
    %c0_i32_0 = arith.constant 0 : i32
    return %arg0, %arg1, %arg3, %c0_i32 : i32, i32, i32, i32
  }
  func.func @transform_3(%arg0: i32, %arg1: i32, %arg2: i32, %arg3: i32) -> (i32, i32, i32) {
    %c0_i32 = arith.constant 0 : i32
    %c0_i32_0 = arith.constant 0 : i32
    return %arg0, %c0_i32, %arg3 : i32, i32, i32
  }
  func.func @transform_4(%arg0: i32, %arg1: i32, %arg2: i32, %arg3: i32) -> (i32, i32, i32, i32) {
    %c0_i32 = arith.constant 0 : i32
    %c0_i32_0 = arith.constant 0 : i32
    return %arg0, %arg1, %arg2, %c0_i32 : i32, i32, i32, i32
  }
}

module attributes {stable_mosaic.version = 11 : i64} {
  func.func @_linear_resid_kernel(%arg0: i32, %arg1: i32, %arg2: i32, %arg3: memref<16x32xf32, #tpu.memory_space<vmem>>, %arg4: memref<32x32xf32, #tpu.memory_space<vmem>>, %arg5: memref<1x32xf32, #tpu.memory_space<vmem>>, %arg6: memref<16x32xf32, #tpu.memory_space<vmem>>, %arg7: memref<16x32xf32, #tpu.memory_space<vmem>>, %arg8: memref<16x32xf32, #tpu.memory_space<vmem>>) attributes {dimension_semantics = [#tpu.dimension_semantics<parallel>, #tpu.dimension_semantics<parallel>, #tpu.dimension_semantics<arbitrary>], iteration_bounds = array<i64: 1, 1, 1>, scalar_prefetch = 0 : i64, scratch_operands = 1 : i64, tpu.core_type = #tpu.core_type<tc>, window_params = [{transform_indices = @transform_0, window_bounds = array<i64: 16, 32>}, {transform_indices = @transform_1, window_bounds = array<i64: 32, 32>}, {transform_indices = @transform_2, window_bounds = array<i64: 1, 32>}, {transform_indices = @transform_3, window_bounds = array<i64: 16, 32>}, {transform_indices = @transform_4, window_bounds = array<i64: 16, 32>}]} {
    %c0_i32 = arith.constant 0 : i32
    %0 = arith.cmpi eq, %arg2, %c0_i32 : i32
    %1 = arith.extui %0 : i1 to i32
    %c0_i32_0 = arith.constant 0 : i32
    %2 = arith.cmpi ne, %1, %c0_i32_0 : i32
    scf.if %2 {
      %cst_10 = arith.constant 0.000000e+00 : f32
      %14 = vector.broadcast %cst_10 : f32 to vector<16x32xf32>
      %c0_11 = arith.constant 0 : index
      %c0_12 = arith.constant 0 : index
      %15 = vector.load %arg8[%c0_11, %c0_12] : memref<16x32xf32, #tpu.memory_space<vmem>>, vector<16x32xf32>
      tpu.vector_store %arg8[%c0_11, %c0_12], %14 {strides = array<i32>} : memref<16x32xf32, #tpu.memory_space<vmem>>, vector<16x32xf32>,
    } else {
    }
    %c0 = arith.constant 0 : index
    %c0_1 = arith.constant 0 : index
    %3 = vector.load %arg8[%c0, %c0_1] : memref<16x32xf32, #tpu.memory_space<vmem>>, vector<16x32xf32>
    %c0_2 = arith.constant 0 : index
    %c0_3 = arith.constant 0 : index
    %4 = vector.load %arg3[%c0_2, %c0_3] : memref<16x32xf32, #tpu.memory_space<vmem>>, vector<16x32xf32>
    %5 = arith.truncf %4 : vector<16x32xf32> to vector<16x32xbf16>
    %c0_4 = arith.constant 0 : index
    %c0_5 = arith.constant 0 : index
    %6 = vector.load %arg4[%c0_4, %c0_5] : memref<32x32xf32, #tpu.memory_space<vmem>>, vector<32x32xf32>
    %7 = arith.truncf %6 : vector<32x32xf32> to vector<32x32xbf16>
    %cst = arith.constant dense<0.000000e+00> : vector<16x32xf32>
    %8 = tpu.matmul %5, %7, %cst {dimension_numbers = #tpu.dot_dimension_numbers<[1], [0], [0], [1], [0, 0, 1, 1], [], []>} : vector<16x32xbf16>, vector<32x32xbf16>, vector<16x32xf32> -> vector<16x32xf32>
    %9 = arith.addf %3, %8 : vector<16x32xf32>
    %c0_6 = arith.constant 0 : index
    %c0_7 = arith.constant 0 : index
    %10 = vector.load %arg8[%c0_6, %c0_7] : memref<16x32xf32, #tpu.memory_space<vmem>>, vector<16x32xf32>
    tpu.vector_store %arg8[%c0_6, %c0_7], %9 {strides = array<i32>} : memref<16x32xf32, #tpu.memory_space<vmem>>, vector<16x32xf32>,
    %c0_i32_8 = arith.constant 0 : i32
    %11 = arith.cmpi eq, %arg2, %c0_i32_8 : i32
    %12 = arith.extui %11 : i1 to i32
    %c0_i32_9 = arith.constant 0 : i32
    %13 = arith.cmpi ne, %12, %c0_i32_9 : i32
    scf.if %13 {
      %c0_10 = arith.constant 0 : index
      %c0_11 = arith.constant 0 : index
      %14 = vector.load %arg8[%c0_10, %c0_11] : memref<16x32xf32, #tpu.memory_space<vmem>>, vector<16x32xf32>
      %c0_12 = arith.constant 0 : index
      %c0_13 = arith.constant 0 : index
      %15 = vector.load %arg5[%c0_12, %c0_13] : memref<1x32xf32, #tpu.memory_space<vmem>>, vector<1x32xf32>
      %16 = vector.broadcast %15 : vector<1x32xf32> to vector<16x32xf32>
      %17 = arith.addf %14, %16 : vector<16x32xf32>
      %c0_14 = arith.constant 0 : index
      %c0_15 = arith.constant 0 : index
      %18 = vector.load %arg6[%c0_14, %c0_15] : memref<16x32xf32, #tpu.memory_space<vmem>>, vector<16x32xf32>
      %19 = arith.addf %17, %18 : vector<16x32xf32>
      %c0_16 = arith.constant 0 : index
      %c0_17 = arith.constant 0 : index
      %20 = vector.load %arg7[%c0_16, %c0_17] : memref<16x32xf32, #tpu.memory_space<vmem>>, vector<16x32xf32>
      tpu.vector_store %arg7[%c0_16, %c0_17], %19 {strides = array<i32>} : memref<16x32xf32, #tpu.memory_space<vmem>>, vector<16x32xf32>,
    } else {
    }
    return
  }
  func.func @transform_0(%arg0: i32, %arg1: i32, %arg2: i32) -> (i32, i32) {
    %c0_i32 = arith.constant 0 : i32
    return %arg0, %arg2 : i32, i32
  }
  func.func @transform_1(%arg0: i32, %arg1: i32, %arg2: i32) -> (i32, i32) {
    %c0_i32 = arith.constant 0 : i32
    return %arg2, %arg1 : i32, i32
  }
  func.func @transform_2(%arg0: i32, %arg1: i32, %arg2: i32) -> (i32, i32) {
    %c0_i32 = arith.constant 0 : i32
    %c0_i32_0 = arith.constant 0 : i32
    return %c0_i32, %arg1 : i32, i32
  }
  func.func @transform_3(%arg0: i32, %arg1: i32, %arg2: i32) -> (i32, i32) {
    %c0_i32 = arith.constant 0 : i32
    return %arg0, %arg1 : i32, i32
  }
  func.func @transform_4(%arg0: i32, %arg1: i32, %arg2: i32) -> (i32, i32) {
    %c0_i32 = arith.constant 0 : i32
    return %arg0, %arg1 : i32, i32
  }
}

module attributes {stable_mosaic.version = 11 : i64} {
  func.func @_ln_linear_kernel(%arg0: i32, %arg1: i32, %arg2: memref<16x32xf32, #tpu.memory_space<vmem>>, %arg3: memref<1x32xf32, #tpu.memory_space<vmem>>, %arg4: memref<1x32xf32, #tpu.memory_space<vmem>>, %arg5: memref<32x64xf32, #tpu.memory_space<vmem>>, %arg6: memref<1x64xf32, #tpu.memory_space<vmem>>, %arg7: memref<16x64xf32, #tpu.memory_space<vmem>>) attributes {dimension_semantics = [#tpu.dimension_semantics<parallel>, #tpu.dimension_semantics<parallel>], iteration_bounds = array<i64: 1, 1>, scalar_prefetch = 0 : i64, scratch_operands = 0 : i64, tpu.core_type = #tpu.core_type<tc>, window_params = [{transform_indices = @transform_0, window_bounds = array<i64: 16, 32>}, {pipeline_mode = #tpu.pipeline_mode<synchronous>, transform_indices = @transform_1, window_bounds = array<i64: 1, 32>}, {pipeline_mode = #tpu.pipeline_mode<synchronous>, transform_indices = @transform_2, window_bounds = array<i64: 1, 32>}, {transform_indices = @transform_3, window_bounds = array<i64: 32, 64>}, {transform_indices = @transform_4, window_bounds = array<i64: 1, 64>}, {transform_indices = @transform_5, window_bounds = array<i64: 16, 64>}]} {
    %c0 = arith.constant 0 : index
    %c0_0 = arith.constant 0 : index
    %0 = vector.load %arg2[%c0, %c0_0] : memref<16x32xf32, #tpu.memory_space<vmem>>, vector<16x32xf32>
    %cst = arith.constant dense<0.000000e+00> : vector<16xf32>
    %1 = vector.multi_reduction <add>, %0, %cst [1] : vector<16x32xf32> to vector<16xf32>
    %2 = vector.shape_cast %1 : vector<16xf32> to vector<16x1xf32>
    %cst_1 = arith.constant 3.200000e+01 : f32
    %3 = vector.broadcast %cst_1 : f32 to vector<16x1xf32>
    %4 = arith.divf %2, %3 : vector<16x1xf32>
    %5 = vector.broadcast %4 : vector<16x1xf32> to vector<16x32xf32>
    %6 = arith.subf %0, %5 : vector<16x32xf32>
    %7 = arith.mulf %6, %6 : vector<16x32xf32>
    %cst_2 = arith.constant dense<0.000000e+00> : vector<16xf32>
    %8 = vector.multi_reduction <add>, %7, %cst_2 [1] : vector<16x32xf32> to vector<16xf32>
    %9 = vector.shape_cast %8 : vector<16xf32> to vector<16x1xf32>
    %cst_3 = arith.constant 0.0322580636 : f32
    %10 = vector.broadcast %cst_3 : f32 to vector<16x1xf32>
    %11 = arith.mulf %9, %10 : vector<16x1xf32>
    %12 = math.sqrt %11 : vector<16x1xf32>
    %cst_4 = arith.constant 9.99999997E-7 : f32
    %13 = vector.broadcast %cst_4 : f32 to vector<16x1xf32>
    %14 = arith.addf %12, %13 : vector<16x1xf32>
    %15 = tpu.reciprocal %14 {approx = true} : vector<16x1xf32> -> vector<16x1xf32>
    %c0_5 = arith.constant 0 : index
    %c0_6 = arith.constant 0 : index
    %16 = vector.load %arg3[%c0_5, %c0_6] : memref<1x32xf32, #tpu.memory_space<vmem>>, vector<1x32xf32>
    %17 = vector.broadcast %16 : vector<1x32xf32> to vector<16x32xf32>
    %18 = arith.mulf %17, %6 : vector<16x32xf32>
    %19 = vector.broadcast %15 : vector<16x1xf32> to vector<16x32xf32>
    %20 = arith.mulf %18, %19 : vector<16x32xf32>
    %c0_7 = arith.constant 0 : index
    %c0_8 = arith.constant 0 : index
    %21 = vector.load %arg4[%c0_7, %c0_8] : memref<1x32xf32, #tpu.memory_space<vmem>>, vector<1x32xf32>
    %22 = vector.broadcast %21 : vector<1x32xf32> to vector<16x32xf32>
    %23 = arith.addf %20, %22 : vector<16x32xf32>
    %24 = arith.truncf %23 : vector<16x32xf32> to vector<16x32xbf16>
    %c0_9 = arith.constant 0 : index
    %c0_10 = arith.constant 0 : index
    %25 = vector.load %arg5[%c0_9, %c0_10] : memref<32x64xf32, #tpu.memory_space<vmem>>, vector<32x64xf32>
    %26 = arith.truncf %25 : vector<32x64xf32> to vector<32x64xbf16>
    %cst_11 = arith.constant dense<0.000000e+00> : vector<16x64xf32>
    %27 = tpu.matmul %24, %26, %cst_11 {dimension_numbers = #tpu.dot_dimension_numbers<[1], [0], [0], [1], [0, 0, 1, 1], [], []>} : vector<16x32xbf16>, vector<32x64xbf16>, vector<16x64xf32> -> vector<16x64xf32>
    %c0_12 = arith.constant 0 : index
    %c0_13 = arith.constant 0 : index
    %28 = vector.load %arg6[%c0_12, %c0_13] : memref<1x64xf32, #tpu.memory_space<vmem>>, vector<1x64xf32>
    %29 = vector.broadcast %28 : vector<1x64xf32> to vector<16x64xf32>
    %30 = arith.addf %27, %29 : vector<16x64xf32>
    %cst_14 = arith.constant 0.000000e+00 : f32
    %31 = vector.broadcast %cst_14 : f32 to vector<16x64xf32>
    %32 = arith.maximumf %30, %31 : vector<16x64xf32>
    %c0_15 = arith.constant 0 : index
    %c0_16 = arith.constant 0 : index
    %33 = vector.load %arg7[%c0_15, %c0_16] : memref<16x64xf32, #tpu.memory_space<vmem>>, vector<16x64xf32>
    tpu.vector_store %arg7[%c0_15, %c0_16], %32 {strides = array<i32>} : memref<16x64xf32, #tpu.memory_space<vmem>>, vector<16x64xf32>,
    return
  }
  func.func @transform_0(%arg0: i32, %arg1: i32) -> (i32, i32) {
    %c0_i32 = arith.constant 0 : i32
    %c0_i32_0 = arith.constant 0 : i32
    return %arg0, %c0_i32 : i32, i32
  }
  func.func @transform_1(%arg0: i32, %arg1: i32) -> (i32, i32) {
    %c0_i32 = arith.constant 0 : i32
    %c0_i32_0 = arith.constant 0 : i32
    %c0_i32_1 = arith.constant 0 : i32
    return %c0_i32, %c0_i32_0 : i32, i32
  }
  func.func @transform_2(%arg0: i32, %arg1: i32) -> (i32, i32) {
    %c0_i32 = arith.constant 0 : i32
    %c0_i32_0 = arith.constant 0 : i32
    %c0_i32_1 = arith.constant 0 : i32
    return %c0_i32, %c0_i32_0 : i32, i32
  }
  func.func @transform_3(%arg0: i32, %arg1: i32) -> (i32, i32) {
    %c0_i32 = arith.constant 0 : i32
    %c0_i32_0 = arith.constant 0 : i32
    return %c0_i32, %arg1 : i32, i32
  }
  func.func @transform_4(%arg0: i32, %arg1: i32) -> (i32, i32) {
    %c0_i32 = arith.constant 0 : i32
    %c0_i32_0 = arith.constant 0 : i32
    return %c0_i32, %arg1 : i32, i32
  }
  func.func @transform_5(%arg0: i32, %arg1: i32) -> (i32, i32) {
    %c0_i32 = arith.constant 0 : i32
    return %arg0, %arg1 : i32, i32
  }
}

module attributes {stable_mosaic.version = 11 : i64} {
  func.func @_layernorm_kernel(%arg0: i32, %arg1: memref<16x32xf32, #tpu.memory_space<vmem>>, %arg2: memref<1x32xf32, #tpu.memory_space<vmem>>, %arg3: memref<1x32xf32, #tpu.memory_space<vmem>>, %arg4: memref<16x32xf32, #tpu.memory_space<vmem>>) attributes {dimension_semantics = [#tpu.dimension_semantics<parallel>], iteration_bounds = array<i64: 1>, scalar_prefetch = 0 : i64, scratch_operands = 0 : i64, tpu.core_type = #tpu.core_type<tc>, window_params = [{transform_indices = @transform_0, window_bounds = array<i64: 16, 32>}, {pipeline_mode = #tpu.pipeline_mode<synchronous>, transform_indices = @transform_1, window_bounds = array<i64: 1, 32>}, {pipeline_mode = #tpu.pipeline_mode<synchronous>, transform_indices = @transform_2, window_bounds = array<i64: 1, 32>}, {transform_indices = @transform_3, window_bounds = array<i64: 16, 32>}]} {
    %c0 = arith.constant 0 : index
    %c0_0 = arith.constant 0 : index
    %0 = vector.load %arg1[%c0, %c0_0] : memref<16x32xf32, #tpu.memory_space<vmem>>, vector<16x32xf32>
    %cst = arith.constant dense<0.000000e+00> : vector<16xf32>
    %1 = vector.multi_reduction <add>, %0, %cst [1] : vector<16x32xf32> to vector<16xf32>
    %2 = vector.shape_cast %1 : vector<16xf32> to vector<16x1xf32>
    %cst_1 = arith.constant 3.200000e+01 : f32
    %3 = vector.broadcast %cst_1 : f32 to vector<16x1xf32>
    %4 = arith.divf %2, %3 : vector<16x1xf32>
    %5 = vector.broadcast %4 : vector<16x1xf32> to vector<16x32xf32>
    %6 = arith.subf %0, %5 : vector<16x32xf32>
    %7 = arith.mulf %6, %6 : vector<16x32xf32>
    %cst_2 = arith.constant dense<0.000000e+00> : vector<16xf32>
    %8 = vector.multi_reduction <add>, %7, %cst_2 [1] : vector<16x32xf32> to vector<16xf32>
    %9 = vector.shape_cast %8 : vector<16xf32> to vector<16x1xf32>
    %cst_3 = arith.constant 0.0322580636 : f32
    %10 = vector.broadcast %cst_3 : f32 to vector<16x1xf32>
    %11 = arith.mulf %9, %10 : vector<16x1xf32>
    %12 = math.sqrt %11 : vector<16x1xf32>
    %cst_4 = arith.constant 9.99999997E-7 : f32
    %13 = vector.broadcast %cst_4 : f32 to vector<16x1xf32>
    %14 = arith.addf %12, %13 : vector<16x1xf32>
    %15 = tpu.reciprocal %14 {approx = true} : vector<16x1xf32> -> vector<16x1xf32>
    %c0_5 = arith.constant 0 : index
    %c0_6 = arith.constant 0 : index
    %16 = vector.load %arg2[%c0_5, %c0_6] : memref<1x32xf32, #tpu.memory_space<vmem>>, vector<1x32xf32>
    %17 = vector.broadcast %16 : vector<1x32xf32> to vector<16x32xf32>
    %18 = arith.mulf %17, %6 : vector<16x32xf32>
    %19 = vector.broadcast %15 : vector<16x1xf32> to vector<16x32xf32>
    %20 = arith.mulf %18, %19 : vector<16x32xf32>
    %c0_7 = arith.constant 0 : index
    %c0_8 = arith.constant 0 : index
    %21 = vector.load %arg3[%c0_7, %c0_8] : memref<1x32xf32, #tpu.memory_space<vmem>>, vector<1x32xf32>
    %22 = vector.broadcast %21 : vector<1x32xf32> to vector<16x32xf32>
    %23 = arith.addf %20, %22 : vector<16x32xf32>
    %c0_9 = arith.constant 0 : index
    %c0_10 = arith.constant 0 : index
    %24 = vector.load %arg4[%c0_9, %c0_10] : memref<16x32xf32, #tpu.memory_space<vmem>>, vector<16x32xf32>
    tpu.vector_store %arg4[%c0_9, %c0_10], %23 {strides = array<i32>} : memref<16x32xf32, #tpu.memory_space<vmem>>, vector<16x32xf32>,
    return
  }
  func.func @transform_0(%arg0: i32) -> (i32, i32) {
    %c0_i32 = arith.constant 0 : i32
    %c0_i32_0 = arith.constant 0 : i32
    return %arg0, %c0_i32 : i32, i32
  }
  func.func @transform_1(%arg0: i32) -> (i32, i32) {
    %c0_i32 = arith.constant 0 : i32
    %c0_i32_0 = arith.constant 0 : i32
    %c0_i32_1 = arith.constant 0 : i32
    return %c0_i32, %c0_i32_0 : i32, i32
  }
  func.func @transform_2(%arg0: i32) -> (i32, i32) {
    %c0_i32 = arith.constant 0 : i32
    %c0_i32_0 = arith.constant 0 : i32
    %c0_i32_1 = arith.constant 0 : i32
    return %c0_i32, %c0_i32_0 : i32, i32
  }
  func.func @transform_3(%arg0: i32) -> (i32, i32) {
    %c0_i32 = arith.constant 0 : i32
    %c0_i32_0 = arith.constant 0 : i32
    return %arg0, %c0_i32 : i32, i32
  }
}

module attributes {stable_mosaic.version = 11 : i64} {
  func.func @_linear_resid_kernel(%arg0: i32, %arg1: i32, %arg2: i32, %arg3: memref<16x64xf32, #tpu.memory_space<vmem>>, %arg4: memref<64x32xf32, #tpu.memory_space<vmem>>, %arg5: memref<1x32xf32, #tpu.memory_space<vmem>>, %arg6: memref<16x32xf32, #tpu.memory_space<vmem>>, %arg7: memref<16x32xf32, #tpu.memory_space<vmem>>, %arg8: memref<16x32xf32, #tpu.memory_space<vmem>>) attributes {dimension_semantics = [#tpu.dimension_semantics<parallel>, #tpu.dimension_semantics<parallel>, #tpu.dimension_semantics<arbitrary>], iteration_bounds = array<i64: 1, 1, 1>, scalar_prefetch = 0 : i64, scratch_operands = 1 : i64, tpu.core_type = #tpu.core_type<tc>, window_params = [{transform_indices = @transform_0, window_bounds = array<i64: 16, 64>}, {transform_indices = @transform_1, window_bounds = array<i64: 64, 32>}, {transform_indices = @transform_2, window_bounds = array<i64: 1, 32>}, {transform_indices = @transform_3, window_bounds = array<i64: 16, 32>}, {transform_indices = @transform_4, window_bounds = array<i64: 16, 32>}]} {
    %c0_i32 = arith.constant 0 : i32
    %0 = arith.cmpi eq, %arg2, %c0_i32 : i32
    %1 = arith.extui %0 : i1 to i32
    %c0_i32_0 = arith.constant 0 : i32
    %2 = arith.cmpi ne, %1, %c0_i32_0 : i32
    scf.if %2 {
      %cst_10 = arith.constant 0.000000e+00 : f32
      %14 = vector.broadcast %cst_10 : f32 to vector<16x32xf32>
      %c0_11 = arith.constant 0 : index
      %c0_12 = arith.constant 0 : index
      %15 = vector.load %arg8[%c0_11, %c0_12] : memref<16x32xf32, #tpu.memory_space<vmem>>, vector<16x32xf32>
      tpu.vector_store %arg8[%c0_11, %c0_12], %14 {strides = array<i32>} : memref<16x32xf32, #tpu.memory_space<vmem>>, vector<16x32xf32>,
    } else {
    }
    %c0 = arith.constant 0 : index
    %c0_1 = arith.constant 0 : index
    %3 = vector.load %arg8[%c0, %c0_1] : memref<16x32xf32, #tpu.memory_space<vmem>>, vector<16x32xf32>
    %c0_2 = arith.constant 0 : index
    %c0_3 = arith.constant 0 : index
    %4 = vector.load %arg3[%c0_2, %c0_3] : memref<16x64xf32, #tpu.memory_space<vmem>>, vector<16x64xf32>
    %5 = arith.truncf %4 : vector<16x64xf32> to vector<16x64xbf16>
    %c0_4 = arith.constant 0 : index
    %c0_5 = arith.constant 0 : index
    %6 = vector.load %arg4[%c0_4, %c0_5] : memref<64x32xf32, #tpu.memory_space<vmem>>, vector<64x32xf32>
    %7 = arith.truncf %6 : vector<64x32xf32> to vector<64x32xbf16>
    %cst = arith.constant dense<0.000000e+00> : vector<16x32xf32>
    %8 = tpu.matmul %5, %7, %cst {dimension_numbers = #tpu.dot_dimension_numbers<[1], [0], [0], [1], [0, 0, 1, 1], [], []>} : vector<16x64xbf16>, vector<64x32xbf16>, vector<16x32xf32> -> vector<16x32xf32>
    %9 = arith.addf %3, %8 : vector<16x32xf32>
    %c0_6 = arith.constant 0 : index
    %c0_7 = arith.constant 0 : index
    %10 = vector.load %arg8[%c0_6, %c0_7] : memref<16x32xf32, #tpu.memory_space<vmem>>, vector<16x32xf32>
    tpu.vector_store %arg8[%c0_6, %c0_7], %9 {strides = array<i32>} : memref<16x32xf32, #tpu.memory_space<vmem>>, vector<16x32xf32>,
    %c0_i32_8 = arith.constant 0 : i32
    %11 = arith.cmpi eq, %arg2, %c0_i32_8 : i32
    %12 = arith.extui %11 : i1 to i32
    %c0_i32_9 = arith.constant 0 : i32
    %13 = arith.cmpi ne, %12, %c0_i32_9 : i32
    scf.if %13 {
      %c0_10 = arith.constant 0 : index
      %c0_11 = arith.constant 0 : index
      %14 = vector.load %arg8[%c0_10, %c0_11] : memref<16x32xf32, #tpu.memory_space<vmem>>, vector<16x32xf32>
      %c0_12 = arith.constant 0 : index
      %c0_13 = arith.constant 0 : index
      %15 = vector.load %arg5[%c0_12, %c0_13] : memref<1x32xf32, #tpu.memory_space<vmem>>, vector<1x32xf32>
      %16 = vector.broadcast %15 : vector<1x32xf32> to vector<16x32xf32>
      %17 = arith.addf %14, %16 : vector<16x32xf32>
      %c0_14 = arith.constant 0 : index
      %c0_15 = arith.constant 0 : index
      %18 = vector.load %arg6[%c0_14, %c0_15] : memref<16x32xf32, #tpu.memory_space<vmem>>, vector<16x32xf32>
      %19 = arith.addf %17, %18 : vector<16x32xf32>
      %c0_16 = arith.constant 0 : index
      %c0_17 = arith.constant 0 : index
      %20 = vector.load %arg7[%c0_16, %c0_17] : memref<16x32xf32, #tpu.memory_space<vmem>>, vector<16x32xf32>
      tpu.vector_store %arg7[%c0_16, %c0_17], %19 {strides = array<i32>} : memref<16x32xf32, #tpu.memory_space<vmem>>, vector<16x32xf32>,
    } else {
    }
    return
  }
  func.func @transform_0(%arg0: i32, %arg1: i32, %arg2: i32) -> (i32, i32) {
    %c0_i32 = arith.constant 0 : i32
    return %arg0, %arg2 : i32, i32
  }
  func.func @transform_1(%arg0: i32, %arg1: i32, %arg2: i32) -> (i32, i32) {
    %c0_i32 = arith.constant 0 : i32
    return %arg2, %arg1 : i32, i32
  }
  func.func @transform_2(%arg0: i32, %arg1: i32, %arg2: i32) -> (i32, i32) {
    %c0_i32 = arith.constant 0 : i32
    %c0_i32_0 = arith.constant 0 : i32
    return %c0_i32, %arg1 : i32, i32
  }
  func.func @transform_3(%arg0: i32, %arg1: i32, %arg2: i32) -> (i32, i32) {
    %c0_i32 = arith.constant 0 : i32
    return %arg0, %arg1 : i32, i32
  }
  func.func @transform_4(%arg0: i32, %arg1: i32, %arg2: i32) -> (i32, i32) {
    %c0_i32 = arith.constant 0 : i32
    return %arg0, %arg1 : i32, i32
  }
}

</mosaic_0001>

<bundles_post_ra>
// kernel: _lambda_.13
= control target key start
LH: loop header
LB: loop body
LE: loop exit
PB: predicated region body
PF: predicated region fallthrough
CT: control target
= control target key end

     0   :  { %vm22_vm0 = vcmask 261120   ;;  %v124_v0 = vmov 0.0   ;;  %vm125_vm1 = vmmov 0   ;;  %s191_s1 = inlined_call_operand.vmem [shape: f32[32,32], index: 1, kind: input, shape index: {}]   ;;  %s192_s0 = inlined_call_operand.vmem [shape: f32[16,32], index: 0, kind: input, shape index: {}]   ;;  %s193_s2 = inlined_call_operand.vmem [shape: f32[1,32], index: 2, kind: input, shape index: {}]   ;;  %s194_s3 = inlined_call_operand.vmem [shape: f32[16,32], index: 3, kind: input, shape index: {}, may-alias: {3,4}]   ;;  %s195_s4 = inlined_call_operand.vmem [shape: f32[16,32], index: 4, kind: output, shape index: {}, may-alias: {3,4}]  }
   0x1   :  { %114 = vmatprep.subr.bf16.mxu0 %v124_v0  ;;  %v32_v1 = vld [vmem:[%s191_s1 + $0x10] sm:$0xff]  ;;  %v33_v2 = vld [vmem:[%s191_s1 + $0x18] sm:$0xff]  ;;  %v30_v3 = vld [vmem:[%s191_s1] sm:$0xff]  ;;  %118 = vmatprep.mubr.msk.bf16.mxu0 %vm125_vm1, %v124_v0  ;;  %23 = vst.msk [vmem:[#allocation2] sm:$0xff] %vm22_vm0, %v124_v0 }
   0x2   :  { %24 = vst.msk [vmem:[#allocation2 + $0x8] sm:$0xff] %vm22_vm0, %v124_v0  ;;  %v35_v4 = vpack.c.bf16 %v33_v2, %v32_v1  ;;  %v31_v5 = vld [vmem:[%s191_s1 + $0x8] sm:$0xff]  ;;  %v27_v7 = vld [vmem:[%s192_s0] sm:$0xff] }
   0x3   :  { %v34_v6 = vpack.c.bf16 %v31_v5, %v30_v3  ;;  %v28_v8 = vld [vmem:[%s192_s0 + $0x8] sm:$0xff]  ;;  %v110_v18 = vld [vmem:[%s193_s2] ss:$0 sm:$0xff] }
   0x4   :  { %115 = vmatpush3.bf16.msra.mxu0 %v35_v4  ;;  %v29_v9 = vpack.c.bf16 %v28_v8, %v27_v7  ;;  %v99_v20 = vld [vmem:[%s194_s3] sm:$0xff]  ;;  %v100_v24 = vld [vmem:[%s194_s3 + $0x8] sm:$0xff] }
   0x5   :  { %116 = vmatprep.subr.bf16.mxu0 %v124_v0 }
   0x8   :  { %117 = vmatpush3.bf16.msra.mxu0 %v34_v6  ;;  %v25_v10 = vld [vmem:[#allocation2] sm:$0xff] }
   0x9   :  { %v26_v14 = vld [vmem:[#allocation2 + $0x8] sm:$0xff] }
   0xb   :  { %119 = vmatmul.mubr.msk.bf16.vlgmr.msra.gmra.mxu0 %vm22_vm0, %v29_v9 }
  0xcb   :  { %v74_v11 = vpop.f32.mrf.mxu0 }
  0xcc   :  { %v81_v12 = vadd.f32 %v74_v11, %v25_v10 }
  0xcd   :  { %v120_v13 = vpop.f32.mrf.mxu0 }
  0xce   :  { %83 = vst.msk [vmem:[#allocation2] sm:$0xff] %vm22_vm0, %v81_v12 }
  0xcf   :  { %v77_v15 = vpop.f32.mrf.mxu0 }
  0xd0   :  { %v82_v16 = vadd.f32 %v77_v15, %v26_v14 }
  0xd1   :  { %v121_v17 = vpop.f32.mrf.mxu0 }
  0xd2   :  { %84 = vst.msk [vmem:[#allocation2 + $0x8] sm:$0xff] %vm22_vm0, %v82_v16 }
  0xd5   :  { %v88_v19 = vld [vmem:[#allocation2] sm:$0xff] }
  0xd6   :  { %v97_v21 = vadd.f32 %v110_v18, %v88_v19 }
  0xd8   :  { %v101_v22 = vadd.f32 %v99_v20, %v97_v21 }
  0xd9   :  { %v89_v23 = vld [vmem:[#allocation2 + $0x8] sm:$0xff] }
  0xda   :  { %103 = vst.msk [vmem:[%s195_s4] sm:$0xff] %vm22_vm0, %v101_v22  ;;  %v98_v25 = vadd.f32 %v110_v18, %v89_v23 }
  0xdc   :  { %v102_v26 = vadd.f32 %v100_v24, %v98_v25 }
  0xde   :  { %104 = vst.msk [vmem:[%s195_s4 + $0x8] sm:$0xff] %vm22_vm0, %v102_v26 }

// kernel: _lambda_.11
= control target key start
LH: loop header
LB: loop body
LE: loop exit
PB: predicated region body
PF: predicated region fallthrough
CT: control target
= control target key end

     0   :  { %vm23_vm0 = vcmask 261120   ;;  %v173_v14 = vmov 0.0   ;;  %vm174_vm1 = vmmov 0   ;;  %vm141_vm6 = vcmask 785408   ;;  %s243_s0 = inlined_call_operand.vmem [shape: f32[16,32], index: 0, kind: input, shape index: {}]   ;;  %s244_s3 = inlined_call_operand.vmem [shape: f32[32,96], index: 3, kind: input, shape index: {}]   ;;  %s245_s1 = inlined_call_operand.vmem [shape: f32[1,32], index: 1, kind: input, shape index: {}]   ;;  %s246_s2 = inlined_call_operand.vmem [shape: f32[1,32], index: 2, kind: input, shape index: {}]   ;;  %s247_s4 = inlined_call_operand.vmem [shape: f32[1,96], index: 4, kind: input, shape index: {}]   ;;  %s248_s5 = inlined_call_operand.vmem [shape: f32[16,96], index: 5, kind: output, shape index: {}]  }
   0x1   :  { %v21_v0 = vld [vmem:[%s243_s0] sm:$0xff]  ;;  %v22_v1 = vld [vmem:[%s243_s0 + $0x8] sm:$0xff]  ;;  %155 = vmatprep.subr.bf16.mxu0 %v173_v14  ;;  %v86_v15 = vld [vmem:[%s244_s3 + $0x10] sm:$0xff]  ;;  %159 = vmatprep.mubr.msk.bf16.mxu0 %vm174_vm1, %v173_v14 }
   0x2   :  { %v24_v2 = vsel %vm23_vm0, %v21_v0, 0.0  ;;  %v27_v3 = vsel %vm23_vm0, %v22_v1, 0.0  ;;  %v87_v16 = vld [vmem:[%s244_s3 + $0x18] sm:$0xff]  ;;  %v84_v17 = vld [vmem:[%s244_s3] sm:$0xff]  ;;  %v85_v19 = vld [vmem:[%s244_s3 + $0x8] sm:$0xff] }
   0x3   :  { %25 = vadd.xlane.f32.xlu0 %v24_v2  ;;  %v89_v18 = vpack.c.bf16 %v87_v16, %v86_v15  ;;  %v88_v20 = vpack.c.bf16 %v85_v19, %v84_v17  ;;  %v148_v37 = vld [vmem:[%s245_s1] ss:$0 sm:$0xff] }
   0x4   :  { %v149_v43 = vld [vmem:[%s246_s2] ss:$0 sm:$0xff] }
   0x5   :  { %156 = vmatpush3.bf16.msra.mxu0 %v89_v18  ;;  %v150_v48 = vld [vmem:[%s247_s4] ss:$0 sm:$0xff] }
   0x6   :  { %157 = vmatprep.subr.bf16.mxu0 %v173_v14 }
   0x7   :  { %28 = vadd.xlane.f32.xlu0 %v27_v3 }
   0x9   :  { %158 = vmatpush3.bf16.msra.mxu0 %v88_v20 }
  0x8c   :  { %v26_v4 = vpop.xlane.xlu0 %25 }
  0x8d   :  { %v31_v5 = vmul.f32 0.03125, %v26_v4 }
  0x8f   :  { %v33_v6 = vsub.f32 %v21_v0, %v31_v5 }
  0x90   :  { %v29_v7 = vpop.xlane.xlu0 %28 }
  0x91   :  { %v32_v8 = vmul.f32 0.03125, %v29_v7  ;;  %v35_v9 = vmul.f32 %v33_v6, %v33_v6  ;;  %v70_v39 = vmul.f32 %v148_v37, %v33_v6 }
  0x93   :  { %v34_v10 = vsub.f32 %v22_v1, %v32_v8  ;;  %v37_v11 = vsel %vm23_vm0, %v35_v9, 0.0 }
  0x94   :  { %38 = vadd.xlane.f32.xlu1 %v37_v11 }
  0x95   :  { %v36_v12 = vmul.f32 %v34_v10, %v34_v10  ;;  %v71_v40 = vmul.f32 %v148_v37, %v34_v10 }
  0x97   :  { %v40_v13 = vsel %vm23_vm0, %v36_v12, 0.0 }
  0x98   :  { %41 = vadd.xlane.f32.xlu1 %v40_v13 }
 0x11d   :  { %v39_v21 = vpop.xlane.xlu1 %38 }
 0x11e   :  { %v43_v22 = vmul.f32 0.032258064, %v39_v21 }
 0x120   :  { %165 = vrsqrt.f32 %v43_v22  ;;  %vm47_vm2 = vcmp.eq.f32.partialorder %v43_v22, inf  ;;  %v50_v27 = vand.u32 2147483648, %v43_v22  ;;  %vm49_vm3 = vcmp.eq.f32.partialorder %v43_v22, 0.0 }
 0x121   :  { %v42_v23 = vpop.xlane.xlu1 %41 }
 0x122   :  { %v44_v24 = vmul.f32 0.032258064, %v42_v23 }
 0x124   :  { %167 = vrsqrt.f32 %v44_v24  ;;  %vm54_vm4 = vcmp.eq.f32.partialorder %v44_v24, inf  ;;  %v57_v33 = vand.u32 2147483648, %v44_v24  ;;  %vm56_vm5 = vcmp.eq.f32.partialorder %v44_v24, 0.0 }
 0x12d   :  { %v166_v25 = vpop.eup %165 }
 0x12e   :  { %v46_v26 = vmul.f32 %v166_v25, %v43_v22 }
 0x130   :  { %v48_v28 = vsel %vm47_vm2, %v43_v22, %v46_v26 }
 0x131   :  { %v168_v29 = vpop.eup %167  ;;  %v51_v30 = vsel %vm49_vm3, %v50_v27, %v48_v28 }
 0x132   :  { %v59_v31 = vadd.f32 1e-06, %v51_v30  ;;  %v53_v32 = vmul.f32 %v168_v29, %v44_v24 }
 0x134   :  { %169 = vrcp.f32 %v59_v31  ;;  %v55_v34 = vsel %vm54_vm4, %v44_v24, %v53_v32 }
 0x135   :  { %v58_v35 = vsel %vm56_vm5, %v57_v33, %v55_v34 }
 0x136   :  { %v60_v36 = vadd.f32 1e-06, %v58_v35 }
 0x138   :  { %171 = vrcp.f32 %v60_v36 }
 0x141   :  { %v170_v38 = vpop.eup %169 }
 0x142   :  { %v72_v41 = vmul.f32 %v170_v38, %v70_v39 }
 0x144   :  { %v81_v45 = vadd.f32 %v149_v43, %v72_v41 }
 0x145   :  { %v172_v42 = vpop.eup %171 }
 0x146   :  { %v73_v44 = vmul.f32 %v172_v42, %v71_v40 }
 0x148   :  { %v82_v46 = vadd.f32 %v149_v43, %v73_v44 }
 0x14a   :  { %v83_v47 = vpack.c.bf16 %v82_v46, %v81_v45 }
 0x14c   :  { %160 = vmatmul.mubr.msk.bf16.vlgmr.msra.gmra.mxu0 %vm23_vm0, %v83_v47 }
 0x20c   :  { %v134_v49 = vpop.f32.mrf.mxu0 }
 0x20d   :  { %v135_v50 = vadd.f32 %v150_v48, %v134_v49 }
 0x20e   :  { %v161_v51 = vpop.f32.mrf.mxu0 }
 0x20f   :  { %142 = vst.msk [vmem:[%s248_s5] sm:$0xff] %vm141_vm6, %v135_v50 }
 0x210   :  { %v137_v52 = vpop.f32.mrf.mxu0 }
 0x211   :  { %v138_v53 = vadd.f32 %v150_v48, %v137_v52 }
 0x212   :  { %v162_v54 = vpop.f32.mrf.mxu0 }
 0x213   :  { %143 = vst.msk [vmem:[%s248_s5 + $0x8] sm:$0xff] %vm141_vm6, %v138_v53 }

// kernel: _lambda_.12
= control target key start
LH: loop header
LB: loop body
LE: loop exit
PB: predicated region body
PF: predicated region fallthrough
CT: control target
= control target key end

     0   :  { %s852_s15 = smov 0   ;;  %s854_s16 = smov 0   ;;  %s930_s0 = inlined_call_operand.vmem [shape: f32[2,4,8,8], index: 0, kind: input, shape index: {}]   ;;  %s931_s1 = inlined_call_operand.vmem [shape: f32[2,4,8,8], index: 1, kind: input, shape index: {}]   ;;  %s932_s2 = inlined_call_operand.vmem [shape: f32[2,4,8,8], index: 2, kind: input, shape index: {}]   ;;  %s933_s3 = inlined_call_operand.vmem [shape: f32[2,1,8], index: 3, kind: input, shape index: {}]   ;;  %s934_s4 = inlined_call_operand.vmem [shape: f32[2,4,8,8], index: 4, kind: output, shape index: {}]  }
   0x1   :  { %s856_s17 = smov 0   ;;  %s858_s18 = smov 0  }
   0x2   :  { %s860_s19 = smov 0  }
   0x3 LB: > { %s36_s20 = sadd.s32 1, %s813_s17  ;;  %s40_s21 = sadd.s32 1, %s817_s18  ;;  %s821_s19 = sphi %s860_s19, %s14_s19   ;;  %s817_s18 = sphi %s858_s18, %s938_s18   ;;  %s813_s17 = sphi %s856_s17, %s937_s17   ;;  %s809_s16 = sphi %s854_s16, %s936_s16   ;;  %s805_s15 = sphi %s852_s15, %s935_s15  }
   0x4   : > { %p38_p0 = scmp.ge.s32.totalorder %s36_s20, 4  ;;  %p702_p1 = scmp.ge.s32.totalorder %s821_s19, 1 }
   0x5   : > { %p255_p2 = scmp.lt.s32.totalorder %s821_s19, 9 }
   0x6   : > { %s940_s20 = smov (%p38_p0, %s36_s20), 0  ;;  %s942_s21 = smov (!%p38_p0, %s40_s21), %s817_s18 }
   0x7   : > { %p256_p3 = pnand %p702_p1, %p255_p2  ;;  %p42_p4 = scmp.ge.s32.totalorder %s942_s21, 2 }
   0x8   : > { %p321_p5 = scmp.lt.s32.totalorder (!%p256_p3), %s809_s16, 1  ;;  %p323_p6 = scmp.lt.s32.totalorder (!%p256_p3), %s805_s15, 3 }
   0x9   : > { %s944_s21 = smov (%p42_p4, %s942_s21), 0  ;;  %259 = sbr.rel (%p256_p3) target bundleno = 799 (0x31f), region = 36 }
   0xe   : > { %vm379_vm0 = vcmask 64512   ;;  %v823_v0 = vmov 0.0   ;;  %vm824_vm1 = vmmov 0   ;;  %s946_s16 = smov (!%p321_p5, %s809_s16), 1  ;;  %s948_s15 = smov (!%p323_p6, %s805_s15), 3  ;;  %v825_v6 = vmov 0  }
   0xf   : > { %719 = vmatprep.subr.bf16.mxu0 %v823_v0  ;;  %380 = vst.msk [vmem:[#allocation4] sm:$0xff] %vm379_vm0, %v823_v0  ;;  %721 = vmatprep.mubr.msk.bf16.mxu0 %vm824_vm1, %v823_v0  ;;  %s703_s22 = sshll.u32 %s946_s16, 2  ;;  %vm376_vm2 = vcmask 7168   ;;  %v826_v7 = vmov -inf   ;;  %s359_s7 = scalar_lea.vmem %s933_s3, %s946_s16  ;;  %v438_v8 = vlaneseq  ;;  %vm479_vm5 = vcmask 1043456  }
  0x10   : > { %725 = vmatprep.subr.bf16.mxu1 %v823_v0  ;;  %727 = vmatprep.mubr.msk.bf16.mxu1 %vm824_vm1, %v823_v0  ;;  %s329_s23 = sadd.s32 %s703_s22, %s948_s15  ;;  %377 = vst.msk [vmem:[#allocation2] sm:$0xff] %vm376_vm2, %v826_v7  ;;  %378 = vst.msk [vmem:[#allocation3] sm:$0xff] %vm376_vm2, %v823_v0  ;;  %v435_v9 = vld [vmem:[%s359_s7] sm:$0x1] }
  0x11   : > { %s883_s24 = sshll.u32 %s329_s23, 3  ;;  %775 = vset.pattern.permute.xlu0 %v825_v6  ;;  %776 = vset.pattern.permute.xlu1 %v825_v6  ;;  %v439_v10 = vshrl.u32 %v438_v8, 7  ;;  %vm436_vm3 = vcmp.eq.f32.partialorder %v435_v9, 0.0 }
  0x12   : > { %s342_s27 = scalar_lea.vmem %s931_s1, %s883_s24  ;;  %s331_s30 = scalar_lea.vmem %s930_s0, %s883_s24  ;;  %v437_v12 = vsel %vm436_vm3, 1, %v825_v6 }
  0x13   : > { %v383_v1 = vld [vmem:[%s342_s27] sm:$0xff]  ;;  %v440_v11 = vsub.s32 0, %v439_v10  ;;  %s353_s10 = scalar_lea.vmem %s932_s2, %s883_s24  ;;  %s370_s13 = scalar_lea.vmem %s934_s4, %s883_s24 }
  0x14   : > { %v384_v2 = vpack.c.bf16 %v383_v1, %v383_v1  ;;  %v381_v4 = vld [vmem:[%s331_s30] sm:$0xff] }
  0x15   : > { %v382_v5 = vpack.c.bf16 %v381_v4, %v381_v4  ;;  %v441_v13 = vrot.slane %v437_v12, %v440_v11  ;;  %v385_v25 = vld [vmem:[%s353_s10] sm:$0xff] }
  0x16   : > { %v392_v3 = vsel %vm379_vm0, %v384_v2, 0  ;;  %v386_v26 = vpack.c.bf16 %v385_v25, %v385_v25  ;;  %v468_v42 = vld [vmem:[#allocation4] sm:$0xff] }
  0x17   : > { %720 = vmatpush3.bf16.xpose.msra.mxu0 %v392_v3  ;;  %vm442_vm4 = vcmp.eq.s32.totalorder %v441_v13, 1  ;;  %v444_v21 = vld [vmem:[#allocation2] sm:$0xff]  ;;  %v460_v36 = vld [vmem:[#allocation3] sm:$0xff] }
  0x18   : > { %v481_v27 = vsel %vm479_vm5, %v386_v26, 0 }
  0x19   : > { %726 = vmatpush3.bf16.msra.mxu1 %v481_v27 }
  0x1e   : > { %722 = vmatmul.mubr.msk.bf16.vlgmr.msra.gmra.mxu0 %vm379_vm0, %v382_v5 }
  0xde   : > { %v428_v14 = vpop.f32.mrf.mxu0 }
  0xdf   : > { %v434_v15 = vmul.f32 0.35355338, %v428_v14 }
  0xe0   : > { %v723_v16 = vpop.f32.mrf.mxu0 }
  0xe1   : > { %v443_v17 = vsel %vm442_vm4, -1e+09, %v434_v15 }
  0xe2   : > { %v431_v18 = vpop.f32.mrf.mxu0  ;;  %v445_v19 = vsel %vm379_vm0, %v443_v17, -inf }
  0xe3   : > { %446 = vmax.xlane.f32.xlu0 %v445_v19 }
  0xe4   : > { %v724_v20 = vpop.f32.mrf.mxu0 }
 0x16c   : > { %v447_v22 = vpop.xlane.xlu0 %446 }
 0x16d   : > { %v448_v23 = vmax.f32 %v444_v21, %v447_v22 }
 0x16f   : > { %v449_v24 = vsub.f32 %v444_v21, %v448_v23  ;;  %525 = vst.msk [vmem:[#allocation2] sm:$0xff] %vm376_vm2, %v448_v23  ;;  %454 = vperm.xlu0 %775, %v448_v23  }
 0x171   : > { %v450_v32 = vmul.f32 1.442695, %v449_v24 }
 0x1ea   : > { %v455_v28 = vpop.permute.xlu0 %454 }
 0x1eb   : > { %v457_v29 = vsub.f32 %v443_v17, %v455_v28 }
 0x1ed   : > { %v458_v30 = vmul.f32 1.442695, %v457_v29 }
 0x1ef   : > { %777 = vpow2.f32 %v458_v30 }
 0x1f0   : > { %779 = vpow2.f32 %v450_v32 }
 0x1fc   : > { %v778_v31 = vpop.eup %777 }
 0x1fd   : > { %v462_v33 = vsel %vm379_vm0, %v778_v31, 0.0  ;;  %v475_v34 = vpack.c.bf16 %v778_v31, %v778_v31  ;;  %v780_v35 = vpop.eup %779 }
 0x1fe   : > { %463 = vadd.xlane.f32.xlu1 %v462_v33  ;;  %v461_v37 = vmul.f32 %v780_v35, %v460_v36 }
 0x1ff   : > { %728 = vmatmul.mubr.msk.bf16.vlgmr.msra.gmra.mxu1 %vm379_vm0, %v475_v34 }
 0x20f   : > { %471 = vperm.xlu1 %776, %v780_v35  }
 0x287   : > { %v464_v38 = vpop.xlane.xlu1 %463 }
 0x288   : > { %v465_v39 = vadd.f32 %v464_v38, %v461_v37 }
 0x28a   : > { %467 = vst.msk [vmem:[#allocation3] sm:$0xff] %vm376_vm2, %v465_v39 }
 0x28b   : > { %v472_v43 = vpop.permute.xlu1 %471 }
 0x28c   : > { %v474_v44 = vmul.f32 %v472_v43, %v468_v42 }
 0x291   : > { %v530_v40 = vld [vmem:[#allocation3] sm:$0xff] }
 0x292   : > { %781 = vrcp.f32 %v530_v40 }
 0x29f   : > { %v782_v41 = vpop.eup %781 }
 0x2a0   : > { %534 = vperm.xlu1 %776, %v782_v41  }
 0x2bf   : > { %v517_v45 = vpop.f32.mrf.mxu1 }
 0x2c0   : > { %v523_v46 = vadd.f32 %v517_v45, %v474_v44 }
 0x2c1   : > { %v729_v47 = vpop.f32.mrf.mxu1 }
 0x2c2   : > { %524 = vst.msk [vmem:[#allocation4] sm:$0xff] %vm379_vm0, %v523_v46 }
 0x2c3   : > { %v520_v48 = vpop.f32.mrf.mxu1 }
 0x2c5   : > { %v730_v49 = vpop.f32.mrf.mxu1 }
 0x2c9   : > { %v529_v50 = vld [vmem:[#allocation4] sm:$0xff] }
 0x31b   : > { %v535_v51 = vpop.permute.xlu1 %534 }
 0x31c   : > { %v537_v52 = vmul.f32 %v535_v51, %v529_v50 }
 0x31e   : > { %538 = vst.msk [vmem:[%s370_s13] sm:$0xff] %vm379_vm0, %v537_v52 }
 0x31f PF: > { %s14_s19 = sadd.s32 1, %s821_s19   ;;  %s935_s15 = smov %s813_s17 }
 0x320   : > { %p11_p7 = scmp.ge.s32.totalorder %s14_s19, 10   ;;  %s936_s16 = smov %s817_s18 }
 0x321   : > { %s937_s17 = smov %s940_s20  ;;  %s938_s18 = smov %s944_s21 }
 0x322   :  { %13 = sbr.rel (!%p11_p7) target bundleno = 3 (0x3), region = 83 }

// kernel: _lambda_.14
= control target key start
LH: loop header
LB: loop body
LE: loop exit
PB: predicated region body
PF: predicated region fallthrough
CT: control target
= control target key end

     0   :  { %vm23_vm0 = vcmask 261120   ;;  %v175_v14 = vmov 0.0   ;;  %vm176_vm1 = vmmov 0   ;;  %vm143_vm6 = vcmask 523264   ;;  %s245_s0 = inlined_call_operand.vmem [shape: f32[16,32], index: 0, kind: input, shape index: {}]   ;;  %s246_s3 = inlined_call_operand.vmem [shape: f32[32,64], index: 3, kind: input, shape index: {}]   ;;  %s247_s1 = inlined_call_operand.vmem [shape: f32[1,32], index: 1, kind: input, shape index: {}]   ;;  %s248_s2 = inlined_call_operand.vmem [shape: f32[1,32], index: 2, kind: input, shape index: {}]   ;;  %s249_s4 = inlined_call_operand.vmem [shape: f32[1,64], index: 4, kind: input, shape index: {}]   ;;  %s250_s5 = inlined_call_operand.vmem [shape: f32[16,64], index: 5, kind: output, shape index: {}]  }
   0x1   :  { %v21_v0 = vld [vmem:[%s245_s0] sm:$0xff]  ;;  %v22_v1 = vld [vmem:[%s245_s0 + $0x8] sm:$0xff]  ;;  %157 = vmatprep.subr.bf16.mxu0 %v175_v14  ;;  %v86_v15 = vld [vmem:[%s246_s3 + $0x10] sm:$0xff]  ;;  %161 = vmatprep.mubr.msk.bf16.mxu0 %vm176_vm1, %v175_v14 }
   0x2   :  { %v24_v2 = vsel %vm23_vm0, %v21_v0, 0.0  ;;  %v27_v3 = vsel %vm23_vm0, %v22_v1, 0.0  ;;  %v87_v16 = vld [vmem:[%s246_s3 + $0x18] sm:$0xff]  ;;  %v84_v17 = vld [vmem:[%s246_s3] sm:$0xff]  ;;  %v85_v19 = vld [vmem:[%s246_s3 + $0x8] sm:$0xff] }
   0x3   :  { %25 = vadd.xlane.f32.xlu0 %v24_v2  ;;  %v89_v18 = vpack.c.bf16 %v87_v16, %v86_v15  ;;  %v88_v20 = vpack.c.bf16 %v85_v19, %v84_v17  ;;  %v150_v37 = vld [vmem:[%s247_s1] ss:$0 sm:$0xff] }
   0x4   :  { %v151_v43 = vld [vmem:[%s248_s2] ss:$0 sm:$0xff] }
   0x5   :  { %158 = vmatpush3.bf16.msra.mxu0 %v89_v18  ;;  %v152_v48 = vld [vmem:[%s249_s4] ss:$0 sm:$0xff] }
   0x6   :  { %159 = vmatprep.subr.bf16.mxu0 %v175_v14 }
   0x7   :  { %28 = vadd.xlane.f32.xlu0 %v27_v3 }
   0x9   :  { %160 = vmatpush3.bf16.msra.mxu0 %v88_v20 }
  0x8c   :  { %v26_v4 = vpop.xlane.xlu0 %25 }
  0x8d   :  { %v31_v5 = vmul.f32 0.03125, %v26_v4 }
  0x8f   :  { %v33_v6 = vsub.f32 %v21_v0, %v31_v5 }
  0x90   :  { %v29_v7 = vpop.xlane.xlu0 %28 }
  0x91   :  { %v32_v8 = vmul.f32 0.03125, %v29_v7  ;;  %v35_v9 = vmul.f32 %v33_v6, %v33_v6  ;;  %v70_v39 = vmul.f32 %v150_v37, %v33_v6 }
  0x93   :  { %v34_v10 = vsub.f32 %v22_v1, %v32_v8  ;;  %v37_v11 = vsel %vm23_vm0, %v35_v9, 0.0 }
  0x94   :  { %38 = vadd.xlane.f32.xlu1 %v37_v11 }
  0x95   :  { %v36_v12 = vmul.f32 %v34_v10, %v34_v10  ;;  %v71_v40 = vmul.f32 %v150_v37, %v34_v10 }
  0x97   :  { %v40_v13 = vsel %vm23_vm0, %v36_v12, 0.0 }
  0x98   :  { %41 = vadd.xlane.f32.xlu1 %v40_v13 }
 0x11d   :  { %v39_v21 = vpop.xlane.xlu1 %38 }
 0x11e   :  { %v43_v22 = vmul.f32 0.032258064, %v39_v21 }
 0x120   :  { %167 = vrsqrt.f32 %v43_v22  ;;  %vm47_vm2 = vcmp.eq.f32.partialorder %v43_v22, inf  ;;  %v50_v27 = vand.u32 2147483648, %v43_v22  ;;  %vm49_vm3 = vcmp.eq.f32.partialorder %v43_v22, 0.0 }
 0x121   :  { %v42_v23 = vpop.xlane.xlu1 %41 }
 0x122   :  { %v44_v24 = vmul.f32 0.032258064, %v42_v23 }
 0x124   :  { %169 = vrsqrt.f32 %v44_v24  ;;  %vm54_vm4 = vcmp.eq.f32.partialorder %v44_v24, inf  ;;  %v57_v33 = vand.u32 2147483648, %v44_v24  ;;  %vm56_vm5 = vcmp.eq.f32.partialorder %v44_v24, 0.0 }
 0x12d   :  { %v168_v25 = vpop.eup %167 }
 0x12e   :  { %v46_v26 = vmul.f32 %v168_v25, %v43_v22 }
 0x130   :  { %v48_v28 = vsel %vm47_vm2, %v43_v22, %v46_v26 }
 0x131   :  { %v170_v29 = vpop.eup %169  ;;  %v51_v30 = vsel %vm49_vm3, %v50_v27, %v48_v28 }
 0x132   :  { %v59_v31 = vadd.f32 1e-06, %v51_v30  ;;  %v53_v32 = vmul.f32 %v170_v29, %v44_v24 }
 0x134   :  { %171 = vrcp.f32 %v59_v31  ;;  %v55_v34 = vsel %vm54_vm4, %v44_v24, %v53_v32 }
 0x135   :  { %v58_v35 = vsel %vm56_vm5, %v57_v33, %v55_v34 }
 0x136   :  { %v60_v36 = vadd.f32 1e-06, %v58_v35 }
 0x138   :  { %173 = vrcp.f32 %v60_v36 }
 0x141   :  { %v172_v38 = vpop.eup %171 }
 0x142   :  { %v72_v41 = vmul.f32 %v172_v38, %v70_v39 }
 0x144   :  { %v81_v45 = vadd.f32 %v151_v43, %v72_v41 }
 0x145   :  { %v174_v42 = vpop.eup %173 }
 0x146   :  { %v73_v44 = vmul.f32 %v174_v42, %v71_v40 }
 0x148   :  { %v82_v46 = vadd.f32 %v151_v43, %v73_v44 }
 0x14a   :  { %v83_v47 = vpack.c.bf16 %v82_v46, %v81_v45 }
 0x14c   :  { %162 = vmatmul.mubr.msk.bf16.vlgmr.msra.gmra.mxu0 %vm23_vm0, %v83_v47 }
 0x20c   :  { %v134_v49 = vpop.f32.mrf.mxu0 }
 0x20d   :  { %v135_v50 = vadd.f32 %v152_v48, %v134_v49 }
 0x20e   :  { %v163_v51 = vpop.f32.mrf.mxu0 }
 0x20f   :  { %v141_v52 = vmax.f32 %v135_v50, 0.0 }
 0x210   :  { %v137_v53 = vpop.f32.mrf.mxu0 }
 0x211   :  { %144 = vst.msk [vmem:[%s250_s5] sm:$0xff] %vm143_vm6, %v141_v52  ;;  %v138_v54 = vadd.f32 %v152_v48, %v137_v53 }
 0x212   :  { %v164_v55 = vpop.f32.mrf.mxu0 }
 0x213   :  { %v142_v56 = vmax.f32 %v138_v54, 0.0 }
 0x215   :  { %145 = vst.msk [vmem:[%s250_s5 + $0x8] sm:$0xff] %vm143_vm6, %v142_v56 }

// kernel: _lambda_.21
= control target key start
LH: loop header
LB: loop body
LE: loop exit
PB: predicated region body
PF: predicated region fallthrough
CT: control target
= control target key end

     0   :  { %vm17_vm0 = vcmask 261120   ;;  %s174_s0 = inlined_call_operand.vmem [shape: f32[16,32], index: 0, kind: input, shape index: {}]   ;;  %s175_s1 = inlined_call_operand.vmem [shape: f32[1,32], index: 1, kind: input, shape index: {}]   ;;  %s176_s2 = inlined_call_operand.vmem [shape: f32[1,32], index: 2, kind: input, shape index: {}]   ;;  %s177_s3 = inlined_call_operand.hbm [shape: f32[16,32], index: 3, kind: output, shape index: {}]  }
   0x1   :  { %v15_v0 = vld [vmem:[%s174_s0] sm:$0xff]  ;;  %v16_v1 = vld [vmem:[%s174_s0 + $0x8] sm:$0xff] }
   0x2   :  { %v18_v2 = vsel %vm17_vm0, %v15_v0, 0.0 }
   0x3   :  { %8 = vsyncpa [#allocation3], 0  ;;  %19 = vadd.xlane.f32.xlu0 %v18_v2  ;;  %v21_v3 = vsel %vm17_vm0, %v16_v1, 0.0  ;;  %v95_v30 = vld [vmem:[%s175_s1] ss:$0 sm:$0xff]  ;;  %s130_s19 = smov [#allocation2]  }
   0x4   :  { %v96_v33 = vld [vmem:[%s176_s2] ss:$0 sm:$0xff]  ;;  %s84_s20 = sshll.u32 %s130_s19, 4  ;;  %s85_s20 = int_to_ptr.vmem [resolvable:$true] %s84_s20 }
   0x5   :  { %s108_s1 = scalar_lea.vmem %s85_s20, 256  ;;  %p113_p1 = scmp.lt.s32.totalorder %s85_s20, %s85_s20 }
   0x6   :  { %p109_p0 = scmp.ne.s32.totalorder %s85_s20, %s108_s1  ;;  %p114_p2 = scmp.lt.s32.totalorder %s108_s1, %s108_s1 }
   0x7   :  { %22 = vadd.xlane.f32.xlu0 %v21_v3 }
   0x8   :  { %p115_p3 = por %p114_p2, %p113_p1 }
   0xa   :  { %p116_p4 = pnand %p115_p3, %p109_p0 }
  0x8c   :  { %v20_v4 = vpop.xlane.xlu0 %19 }
  0x8d   :  { %v25_v5 = vmul.f32 0.03125, %v20_v4 }
  0x8f   :  { %v27_v6 = vsub.f32 %v15_v0, %v25_v5 }
  0x90   :  { %v23_v7 = vpop.xlane.xlu0 %22 }
  0x91   :  { %v26_v8 = vmul.f32 0.03125, %v23_v7  ;;  %v29_v9 = vmul.f32 %v27_v6, %v27_v6  ;;  %v64_v31 = vmul.f32 %v95_v30, %v27_v6 }
  0x93   :  { %v28_v10 = vsub.f32 %v16_v1, %v26_v8  ;;  %v31_v11 = vsel %vm17_vm0, %v29_v9, 0.0 }
  0x94   :  { %32 = vadd.xlane.f32.xlu1 %v31_v11 }
  0x95   :  { %v30_v12 = vmul.f32 %v28_v10, %v28_v10  ;;  %v65_v35 = vmul.f32 %v95_v30, %v28_v10 }
  0x97   :  { %v34_v13 = vsel %vm17_vm0, %v30_v12, 0.0 }
  0x98   :  { %35 = vadd.xlane.f32.xlu1 %v34_v13 }
 0x11d   :  { %v33_v14 = vpop.xlane.xlu1 %32 }
 0x11e   :  { %v37_v15 = vmul.f32 0.032258064, %v33_v14 }
 0x120   :  { %100 = vrsqrt.f32 %v37_v15  ;;  %vm41_vm1 = vcmp.eq.f32.partialorder %v37_v15, inf  ;;  %v44_v20 = vand.u32 2147483648, %v37_v15  ;;  %vm43_vm2 = vcmp.eq.f32.partialorder %v37_v15, 0.0 }
 0x121   :  { %v36_v16 = vpop.xlane.xlu1 %35 }
 0x122   :  { %v38_v17 = vmul.f32 0.032258064, %v36_v16 }
 0x124   :  { %102 = vrsqrt.f32 %v38_v17  ;;  %vm48_vm3 = vcmp.eq.f32.partialorder %v38_v17, inf  ;;  %v51_v26 = vand.u32 2147483648, %v38_v17  ;;  %vm50_vm4 = vcmp.eq.f32.partialorder %v38_v17, 0.0 }
 0x12d   :  { %v101_v18 = vpop.eup %100 }
 0x12e   :  { %v40_v19 = vmul.f32 %v101_v18, %v37_v15 }
 0x130   :  { %v42_v21 = vsel %vm41_vm1, %v37_v15, %v40_v19 }
 0x131   :  { %v103_v22 = vpop.eup %102  ;;  %v45_v23 = vsel %vm43_vm2, %v44_v20, %v42_v21 }
 0x132   :  { %v53_v24 = vadd.f32 1e-06, %v45_v23  ;;  %v47_v25 = vmul.f32 %v103_v22, %v38_v17 }
 0x134   :  { %104 = vrcp.f32 %v53_v24  ;;  %v49_v27 = vsel %vm48_vm3, %v38_v17, %v47_v25 }
 0x135   :  { %v52_v28 = vsel %vm50_vm4, %v51_v26, %v49_v27 }
 0x136   :  { %v54_v29 = vadd.f32 1e-06, %v52_v28 }
 0x138   :  { %106 = vrcp.f32 %v54_v29 }
 0x141   :  { %v105_v32 = vpop.eup %104 }
 0x142   :  { %v66_v34 = vmul.f32 %v105_v32, %v64_v31 }
 0x144   :  { %v75_v36 = vadd.f32 %v96_v33, %v66_v34 }
 0x145   :  { %v107_v37 = vpop.eup %106 }
 0x146   :  { %v67_v38 = vmul.f32 %v107_v37, %v65_v35  ;;  %77 = vst.msk [vmem:[#allocation2] sm:$0xff] %vm17_vm0, %v75_v36 }
 0x148   :  { %v76_v39 = vadd.f32 %v96_v33, %v67_v38 }
 0x14a   :  { %78 = vst.msk [vmem:[#allocation2 + $0x8] sm:$0xff] %vm17_vm0, %v76_v39 }
 0x14b   :  { %119 = shalt.err (!%p116_p4)
}
 0x14c   :  { %s131_s2 = smov 128   ;;  %s132_s21 = smov 8  }
 0x14d   :  { %90 = dma.vmem_to_hbm [thread:$0]  %s85_s20, 256, %s177_s3, [#allocation3], %s131_s2, %s131_s2, %s132_s21  }
 0x14e   :  { %128 = dma.done.wait [#allocation3], 256  }
 0x14f   :  { %129 = vsyncadd [#allocation3], 4294967040 }
 0x150   :  { %94 = vsyncpa [#allocation3], 1 }

// kernel: _lambda_.15
= control target key start
LH: loop header
LB: loop body
LE: loop exit
PB: predicated region body
PF: predicated region fallthrough
CT: control target
= control target key end

     0   :  { %vm22_vm0 = vcmask 261120   ;;  %v137_v0 = vmov 0.0   ;;  %vm138_vm1 = vmmov 0   ;;  %vm42_vm2 = vcmask 523264   ;;  %s215_s1 = inlined_call_operand.vmem [shape: f32[64,32], index: 1, kind: input, shape index: {}]   ;;  %s216_s0 = inlined_call_operand.vmem [shape: f32[16,64], index: 0, kind: input, shape index: {}]   ;;  %s217_s2 = inlined_call_operand.vmem [shape: f32[1,32], index: 2, kind: input, shape index: {}]   ;;  %s218_s3 = inlined_call_operand.vmem [shape: f32[16,32], index: 3, kind: input, shape index: {}, may-alias: {3,4}]   ;;  %s219_s4 = inlined_call_operand.vmem [shape: f32[16,32], index: 4, kind: output, shape index: {}, may-alias: {3,4}]  }
   0x1   :  { %123 = vmatprep.subr.bf16.mxu0 %v137_v0  ;;  %v36_v1 = vld [vmem:[%s215_s1 + $0x30] sm:$0xff]  ;;  %v37_v2 = vld [vmem:[%s215_s1 + $0x38] sm:$0xff]  ;;  %v34_v3 = vld [vmem:[%s215_s1 + $0x20] sm:$0xff]  ;;  %131 = vmatprep.mubr.msk.bf16.mxu0 %vm138_vm1, %v137_v0  ;;  %23 = vst.msk [vmem:[#allocation2] sm:$0xff] %vm22_vm0, %v137_v0 }
   0x2   :  { %24 = vst.msk [vmem:[#allocation2 + $0x8] sm:$0xff] %vm22_vm0, %v137_v0  ;;  %v41_v4 = vpack.c.bf16 %v37_v2, %v36_v1  ;;  %v35_v5 = vld [vmem:[%s215_s1 + $0x28] sm:$0xff]  ;;  %v32_v7 = vld [vmem:[%s215_s1 + $0x10] sm:$0xff]  ;;  %v33_v8 = vld [vmem:[%s215_s1 + $0x18] sm:$0xff] }
   0x3   :  { %v40_v6 = vpack.c.bf16 %v35_v5, %v34_v3  ;;  %v39_v9 = vpack.c.bf16 %v33_v8, %v32_v7  ;;  %v30_v10 = vld [vmem:[%s215_s1] sm:$0xff]  ;;  %v31_v11 = vld [vmem:[%s215_s1 + $0x8] sm:$0xff] }
   0x4   :  { %124 = vmatpush3.bf16.msra.mxu0 %v41_v4  ;;  %v38_v12 = vpack.c.bf16 %v31_v11, %v30_v10  ;;  %v27_v13 = vld [vmem:[%s216_s0] sm:$0xff]  ;;  %v28_v14 = vld [vmem:[%s216_s0 + $0x8] sm:$0xff] }
   0x5   :  { %125 = vmatprep.subr.bf16.mxu0 %v137_v0  ;;  %v29_v15 = vpack.c.bf16 %v28_v14, %v27_v13  ;;  %v117_v24 = vld [vmem:[%s217_s2] ss:$0 sm:$0xff]  ;;  %v107_v29 = vld [vmem:[%s218_s3 + $0x8] sm:$0xff] }
   0x6   :  { %v106_v26 = vld [vmem:[%s218_s3] sm:$0xff] }
   0x8   :  { %126 = vmatpush3.bf16.msra.mxu0 %v40_v6  ;;  %v25_v16 = vld [vmem:[#allocation2] sm:$0xff] }
   0x9   :  { %127 = vmatprep.subr.bf16.mxu0 %v137_v0  ;;  %v26_v20 = vld [vmem:[#allocation2 + $0x8] sm:$0xff] }
   0xc   :  { %128 = vmatpush3.bf16.msra.mxu0 %v39_v9 }
   0xd   :  { %129 = vmatprep.subr.bf16.mxu0 %v137_v0 }
  0x10   :  { %130 = vmatpush3.bf16.msra.mxu0 %v38_v12 }
  0x13   :  { %132 = vmatmul.mubr.msk.bf16.vlgmr.msra.gmra.mxu0 %vm42_vm2, %v29_v15 }
  0xd3   :  { %v80_v17 = vpop.f32.mrf.mxu0 }
  0xd4   :  { %v87_v18 = vadd.f32 %v80_v17, %v25_v16 }
  0xd5   :  { %v133_v19 = vpop.f32.mrf.mxu0 }
  0xd6   :  { %90 = vst.msk [vmem:[#allocation2] sm:$0xff] %vm22_vm0, %v87_v18 }
  0xd7   :  { %v83_v21 = vpop.f32.mrf.mxu0 }
  0xd8   :  { %v88_v22 = vadd.f32 %v83_v21, %v26_v20 }
  0xd9   :  { %v134_v23 = vpop.f32.mrf.mxu0 }
  0xda   :  { %91 = vst.msk [vmem:[#allocation2 + $0x8] sm:$0xff] %vm22_vm0, %v88_v22 }
  0xdd   :  { %v95_v25 = vld [vmem:[#allocation2] sm:$0xff] }
  0xde   :  { %v104_v27 = vadd.f32 %v117_v24, %v95_v25 }
  0xe0   :  { %v108_v28 = vadd.f32 %v106_v26, %v104_v27 }
  0xe1   :  { %v96_v30 = vld [vmem:[#allocation2 + $0x8] sm:$0xff] }
  0xe2   :  { %110 = vst.msk [vmem:[%s219_s4] sm:$0xff] %vm22_vm0, %v108_v28  ;;  %v105_v31 = vadd.f32 %v117_v24, %v96_v30 }
  0xe4   :  { %v109_v32 = vadd.f32 %v107_v29, %v105_v31 }
  0xe6   :  { %111 = vst.msk [vmem:[%s219_s4 + $0x8] sm:$0xff] %vm22_vm0, %v109_v32 }

</bundles_post_ra>
